<compile_context>
chip_gen: v5e
topology: v5e:2x2
jax: 0.10.0
libtpu: 0.0.40
codegen_flags: <defaults>
</compile_context>

<pallas_src>
import functools

import numpy as np
import jax
import jax.numpy as jnp
from jax import lax
from jax.experimental import pallas as pl
from jax.experimental.pallas import tpu as pltpu


# ---------------------------------------------------------------------------
# Sub-pixel decomposition tables for stride-2 / pad-1 / k=3 transposed convs.
# (identical to the previously validated version; reused to build the composed
#  conv3 ∘ conv4 ∘ conv5 weights numerically.)
# ---------------------------------------------------------------------------
def _deconv3_blocks(w):
    """w: (Cin, Cout, 3, 3) -> blocks (4, Cin, 4*Cout).

    blocks[a0*2+b0][ci, (py*2+px)*Cout + co] multiplies the input shifted by
    (a0, b0) when producing intermediate phase (py, px)."""
    cin, cout = w.shape[0], w.shape[1]
    tab = []
    for a0 in (0, 1):
        for k in (0, 1, 2):
            ph = 2 * a0 + k - 1
            if 0 <= ph < 2:
                tab.append((ph, a0, k))
    blocks = np.zeros((4, cin, 4 * cout), np.float32)
    for (py, a0, ky) in tab:
        for (px, b0, kx) in tab:
            col = (py * 2 + px) * cout
            blocks[a0 * 2 + b0, :, col:col + cout] += w[:, :, ky, kx]
    return blocks


def _deconv5_blocks(w):
    """w: (Cin, 1, 3, 3), input already in 4-phase column form.

    Returns blocks (4, 4*Cin, 16):
      blocks[a0*2+b0][(qy*2+qx)*Cin + ci, fy*4+fx]."""
    cin = w.shape[0]
    tab = []
    for a0 in (0, 1):
        for qy in (0, 1):
            for ky in (0, 1, 2):
                fy = 4 * a0 + 2 * qy + ky - 1
                if 0 <= fy < 4:
                    tab.append((fy, a0, qy, ky))
    blocks = np.zeros((4, 4 * cin, 16), np.float32)
    for (fy, a0, qy, ky) in tab:
        for (fx, b0, qx, kx) in tab:
            for ci in range(cin):
                blocks[a0 * 2 + b0, (qy * 2 + qx) * cin + ci, fy * 4 + fx] += w[ci, 0, ky, kx]
    return blocks


# ---------------------------------------------------------------------------
# The single fused Pallas kernel (whole network, one grid step per nb images).
# ---------------------------------------------------------------------------
def _fused_net_kernel(x_ref, w12_ref, b12_ref, w345_ref, bias_ref,
                      out_ref, p7_ref, *, nb, hb, wb):
    f32 = jnp.float32
    bf16 = jnp.bfloat16
    P = nb * hb * wb

    # ---- stage A: conv1(3x3, s2, p1) + conv2(1x1) folded -> one K=72 matmul
    xa = x_ref[...].reshape(P, 72)
    v2 = jnp.dot(xa, w12_ref[...], preferred_element_type=f32) + b12_ref[...]

    # ---- exact erf-GELU (v3..v7 of the PyTorch module), kept in f32
    v7 = (v2 * 0.5) * (lax.erf(v2 * 0.7071067811865476) + 1.0)

    # ---- stage B: composed conv3 o conv4 o conv5 (all linear post-GELU).
    # Only the 1-wide halo row/column is cleared (interior is fully overwritten
    # each step); done every step so it is megacore-safe under "parallel".
    p7_ref[:, hb:hb + 1, :, :] = jnp.zeros((nb, 1, wb + 1, 8), bf16)
    p7_ref[:, :, wb:wb + 1, :] = jnp.zeros((nb, hb + 1, 1, 8), bf16)
    p7_ref[:, 0:hb, 0:wb, :] = v7.astype(bf16).reshape(nb, hb, wb, 8)

    acc = jnp.zeros((P, 16), f32)
    for a0 in (0, 1):
        for b0 in (0, 1):
            slab = p7_ref[:, a0:a0 + hb, b0:b0 + wb, :].reshape(P, 8)
            acc = acc + jnp.dot(slab, w345_ref[a0 * 2 + b0],
                                preferred_element_type=f32)

    # 16 sub-pixel output phases per coarse position + composite bias map
    out_ref[...] = acc.reshape(nb, hb, wb, 16) + bias_ref[...]


def fused_forward(x_cat, wp, *, nb, hb, wb, n_imgs):
    """x_cat: (N, hb, wb, 72) bf16 -> (N, hb, wb, 16) f32 (16 output phases)."""
    grid = (n_imgs // nb,)
    kernel = functools.partial(_fused_net_kernel, nb=nb, hb=hb, wb=wb)

    p_tot = n_imgs * hb * wb
    cost = pl.CostEstimate(
        flops=int(2 * p_tot * (72 * 8 + 4 * 8 * 16)),
        transcendentals=int(p_tot * 8),
        bytes_accessed=int(p_tot * 72 * 2 + p_tot * 16 * 4
                           + (72 * 8 + 4 * 8 * 16) * 2
                           + (8 + hb * wb * 16) * 4),
    )

    return pl.pallas_call(
        kernel,
        out_shape=jax.ShapeDtypeStruct((n_imgs, hb, wb, 16), jnp.float32),
        grid=grid,
        in_specs=[
            pl.BlockSpec((nb, hb, wb, 72), lambda i: (i, 0, 0, 0)),
            pl.BlockSpec((72, 8), lambda i: (0, 0)),
            pl.BlockSpec((1, 8), lambda i: (0, 0)),
            pl.BlockSpec((4, 8, 16), lambda i: (0, 0, 0)),
            pl.BlockSpec((hb, wb, 16), lambda i: (0, 0, 0)),
        ],
        out_specs=pl.BlockSpec((nb, hb, wb, 16), lambda i: (i, 0, 0, 0)),
        scratch_shapes=[pltpu.VMEM((nb, hb + 1, wb + 1, 8), jnp.bfloat16)],
        compiler_params=pltpu.CompilerParams(
            dimension_semantics=("parallel",)),
        cost_estimate=cost,
    )(x_cat, wp["w12"], wp["b12"], wp["w345"], wp["bias_map"])


# ---------------------------------------------------------------------------
# Parameters: PyTorch-style init + one-time folding/composition for the kernel.
# ---------------------------------------------------------------------------
def init_params(key):
    ks = jax.random.split(key, 10)

    def w(k, shape, fan_in):
        bound = 1.0 / np.sqrt(fan_in)
        return jax.random.uniform(k, shape, jnp.float32, -bound, bound)

    return {
        # Conv2d(8, 16, 3, stride=2, padding=1)
        "w1": w(ks[0], (16, 8, 3, 3), 8 * 9), "b1": w(ks[1], (16,), 8 * 9),
        # Conv2d(16, 8, 1)
        "w2": w(ks[2], (8, 16, 1, 1), 16), "b2": w(ks[3], (8,), 16),
        # ConvTranspose2d(8, 8, 3, stride=2, padding=1, output_padding=1)  (see TODO above)
        "w3": w(ks[4], (8, 8, 3, 3), 8 * 9), "b3": w(ks[5], (8,), 8 * 9),
        # ConvTranspose2d(8, 4, 1)
        "w4": w(ks[6], (8, 4, 1, 1), 8), "b4": w(ks[7], (4,), 8),
        # ConvTranspose2d(4, 1, 3, stride=2, padding=1, output_padding=1)
        "w5": w(ks[8], (4, 1, 3, 3), 4 * 9), "b5": w(ks[9], (1,), 4 * 9),
    }


def prepare_params(p, input_hw):
    """One-time fold of conv2 into conv1 and composition of conv3/4/5."""
    f32 = np.float32
    H, W = input_hw
    assert H % 2 == 0 and W % 2 == 0
    hb, wb = H // 2, W // 2

    w1 = np.asarray(p["w1"], f32); b1 = np.asarray(p["b1"], f32)   # (16,8,3,3)
    w2 = np.asarray(p["w2"], f32); b2 = np.asarray(p["b2"], f32)   # (8,16,1,1)
    w3 = np.asarray(p["w3"], f32); b3 = np.asarray(p["b3"], f32)   # (8,8,3,3)
    w4 = np.asarray(p["w4"], f32); b4 = np.asarray(p["b4"], f32)   # (8,4,1,1)
    w5 = np.asarray(p["w5"], f32); b5 = np.asarray(p["b5"], f32)   # (4,1,3,3)

    # ---- stage A: conv2 (1x1) folded into conv1 -> (72, 8), rows = (dy*3+dx)*8+ci
    w2m = w2[:, :, 0, 0]                                   # (8 out, 16 mid)
    w12 = np.zeros((72, 8), f32)
    for dy in range(3):
        for dx in range(3):
            blk = np.einsum("om,mi->io", w2m, w1[:, :, dy, dx])   # (8 in, 8 out)
            w12[(dy * 3 + dx) * 8:(dy * 3 + dx + 1) * 8, :] = blk
    b12 = w2m @ b1 + b2                                    # (8,)

    # ---- stage B: conv3 o conv4 o conv5 composed into per-shift (8, 16) blocks
    blocks3 = _deconv3_blocks(w3)                          # (4, 8, 32)
    blocks5 = _deconv5_blocks(w5)                          # (4, 16, 16)
    w4m = w4[:, :, 0, 0]                                   # (8, 4)
    w4bd = np.zeros((32, 16), f32)                         # block-diag over 4 phases
    for ph in range(4):
        w4bd[ph * 8:(ph + 1) * 8, ph * 4:(ph + 1) * 4] = w4m

    w345 = np.zeros((2, 2, 8, 16), f32)
    leak = 0.0
    for a3y in (0, 1):
        for a3x in (0, 1):
            m34 = blocks3[a3y * 2 + a3x] @ w4bd            # (8, 16)
            for a5y in (0, 1):
                for a5x in (0, 1):
                    m = m34 @ blocks5[a5y * 2 + a5x]       # (8, 16)
                    sy, sx = a3y + a5y, a3x + a5x
                    if sy < 2 and sx < 2:
                        w345[sy, sx] += m
                    else:
                        leak = max(leak, float(np.abs(m).max()))
    # shift-2 blocks are structurally zero (conv3 shift-1 taps write only the odd
    # intermediate phase, conv5 shift-1 taps read only the even one)
    assert leak == 0.0, leak
    w345 = w345.reshape(4, 8, 16)                          # j = a0*2 + b0

    # ---- composite bias: b3/b4 pushed through conv5 + b5, with the boundary
    #      correction at the last output row/column (conv5 sees one fewer valid
    #      input block there).
    b34 = np.tile(b3, 4) @ w4bd + np.tile(b4, 4)           # (16,) per v9 phase-col
    bias_map = np.full((hb, wb, 16), b5[0], f32)
    for a5y in (0, 1):
        for a5x in (0, 1):
            bc = b34 @ blocks5[a5y * 2 + a5x]              # (16,)
            bias_map[:hb - a5y, :wb - a5x, :] += bc

    return {
        "w12": jnp.asarray(w12, jnp.bfloat16),
        "b12": jnp.asarray(b12, jnp.float32).reshape(1, 8),
        "w345": jnp.asarray(w345, jnp.bfloat16),
        "bias_map": jnp.asarray(bias_map, jnp.float32),
    }


# ---------------------------------------------------------------------------
# Forward pass (host glue is only pad + 9-tap channel concat + final interleave).
# ---------------------------------------------------------------------------
@functools.partial(jax.jit, static_argnames=("nb",))
def forward(prepped, x_nchw, nb=None):
    x = jnp.transpose(x_nchw, (0, 2, 3, 1)).astype(jnp.float32)   # NHWC
    N, H, W, C = x.shape
    assert C == 8 and H % 2 == 0 and W % 2 == 0
    hb, wb = H // 2, W // 2
    assert hb % 8 == 0 and wb % 8 == 0
    assert prepped["bias_map"].shape == (hb, wb, 16), "prepare_params H/W mismatch"

    if nb is None:                                   # 2 grid steps when possible
        nb = N // 2 if (N % 2 == 0 and N >= 2) else N   # (v7x megacore); <1us cost
    assert N % nb == 0                                  # on single-core v5e/v6e

    # conv1 contraction layout built host-side: 9 taps x 8 channels = 72 lanes
    xp = jnp.pad(x, ((0, 0), (1, 1), (1, 1), (0, 0)))             # (N, H+2, W+2, 8)
    taps = [xp[:, dy:dy + 2 * hb:2, dx:dx + 2 * wb:2, :]
            for dy in range(3) for dx in range(3)]
    x_cat = jnp.concatenate(taps, axis=-1).astype(jnp.bfloat16)   # (N, hb, wb, 72)

    out_k = fused_forward(x_cat, prepped, nb=nb, hb=hb, wb=wb, n_imgs=N)

    # interleave the 16 sub-pixel phases: out[n, 0, 4a+fy, 4b+fx] = out_k[n,a,b,fy*4+fx]
    out = (out_k.reshape(N, hb, wb, 4, 4)
                 .transpose(0, 1, 3, 2, 4)
                 .reshape(N, 1, 4 * hb, 4 * wb))
    return out


# ---------------------------------------------------------------------------
# Pure-JAX f32 reference (same fixed conv3 in_channels) for a sanity check.
# ---------------------------------------------------------------------------
def reference_forward(params, x):
    def conv(x, w, b, stride, pad):
        out = lax.conv_general_dilated(
            x, w, (stride, stride), [(pad, pad), (pad, pad)],
            dimension_numbers=("NCHW", "OIHW", "NCHW"))
        return out + b.reshape(1, -1, 1, 1)

    def deconv(x, w, b, stride, pad, opad):
        k = w.shape[2]
        wc = jnp.flip(jnp.transpose(w, (1, 0, 2, 3)), (2, 3))
        lo, hi = k - 1 - pad, k - 1 - pad + opad
        out = lax.conv_general_dilated(
            x, wc, (1, 1), [(lo, hi), (lo, hi)],
            lhs_dilation=(stride, stride),
            dimension_numbers=("NCHW", "OIHW", "NCHW"))
        return out + b.reshape(1, -1, 1, 1)

    v1 = conv(x, params["w1"], params["b1"], 2, 1)
    v2 = conv(v1, params["w2"], params["b2"], 1, 0)
    v7 = (v2 * 0.5) * (lax.erf(v2 * 0.7071067811865476) + 1.0)
    v8 = deconv(v7, params["w3"], params["b3"], 2, 1, 1)
    v9 = deconv(v8, params["w4"], params["b4"], 1, 0, 0)
    return deconv(v9, params["w5"], params["b5"], 2, 1, 1)


if __name__ == "__main__":
    key = jax.random.PRNGKey(0)
    pkey, xkey = jax.random.split(key)
    params = init_params(pkey)

    # Small input consistent with the module: batch=2, channels=8, spatial=16
    x = jax.random.normal(xkey, (2, 8, 16, 16), jnp.float32)
    prepped = prepare_params(params, input_hw=(16, 16))

    out = forward(prepped, x)
    out = jax.block_until_ready(out)
    assert out.shape == (2, 1, 32, 32), out.shape
    assert out.dtype == jnp.float32

    # numerical sanity vs. a pure-JAX f32 reference (kernel uses bf16 operands)
    ref = reference_forward(params, x)
    err = float(jnp.max(jnp.abs(out - ref)))
    assert err < 5e-2, f"max abs err {err}"

    print("KERNEL_OK")
</pallas_src>

<mosaic_0001>
module attributes {stable_mosaic.version = 11 : i64} {
  func.func @_fused_net_kernel(%arg0: i32, %arg1: memref<1x8x8x72xbf16, #tpu.memory_space<vmem>>, %arg2: memref<72x8xbf16, #tpu.memory_space<vmem>>, %arg3: memref<1x8xf32, #tpu.memory_space<vmem>>, %arg4: memref<4x8x16xbf16, #tpu.memory_space<vmem>>, %arg5: memref<8x8x16xf32, #tpu.memory_space<vmem>>, %arg6: memref<1x8x8x16xf32, #tpu.memory_space<vmem>>, %arg7: memref<1x9x9x8xbf16, #tpu.memory_space<vmem>>) attributes {dimension_semantics = [#tpu.dimension_semantics<parallel>], iteration_bounds = array<i64: 2>, scalar_prefetch = 0 : i64, scratch_operands = 1 : i64, tpu.core_type = #tpu.core_type<tc>, window_params = [{transform_indices = @transform_0, window_bounds = array<i64: 1, 8, 8, 72>}, {pipeline_mode = #tpu.pipeline_mode<synchronous>, transform_indices = @transform_1, window_bounds = array<i64: 72, 8>}, {pipeline_mode = #tpu.pipeline_mode<synchronous>, transform_indices = @transform_2, window_bounds = array<i64: 1, 8>}, {pipeline_mode = #tpu.pipeline_mode<synchronous>, transform_indices = @transform_3, window_bounds = array<i64: 4, 8, 16>}, {pipeline_mode = #tpu.pipeline_mode<synchronous>, transform_indices = @transform_4, window_bounds = array<i64: 8, 8, 16>}, {transform_indices = @transform_5, window_bounds = array<i64: 1, 8, 8, 16>}]} {
    %c0 = arith.constant 0 : index
    %c0_0 = arith.constant 0 : index
    %c0_1 = arith.constant 0 : index
    %c0_2 = arith.constant 0 : index
    %0 = vector.load %arg1[%c0, %c0_0, %c0_1, %c0_2] : memref<1x8x8x72xbf16, #tpu.memory_space<vmem>>, vector<1x8x8x72xbf16>
    %1 = vector.shape_cast %0 : vector<1x8x8x72xbf16> to vector<64x72xbf16>
    %c0_3 = arith.constant 0 : index
    %c0_4 = arith.constant 0 : index
    %2 = vector.load %arg2[%c0_3, %c0_4] : memref<72x8xbf16, #tpu.memory_space<vmem>>, vector<72x8xbf16>
    %cst = arith.constant dense<0.000000e+00> : vector<64x8xf32>
    %3 = tpu.matmul %1, %2, %cst {dimension_numbers = #tpu.dot_dimension_numbers<[1], [0], [0], [1], [0, 0, 1, 1], [], []>} : vector<64x72xbf16>, vector<72x8xbf16>, vector<64x8xf32> -> vector<64x8xf32>
    %c0_5 = arith.constant 0 : index
    %c0_6 = arith.constant 0 : index
    %4 = vector.load %arg3[%c0_5, %c0_6] : memref<1x8xf32, #tpu.memory_space<vmem>>, vector<1x8xf32>
    %5 = vector.broadcast %4 : vector<1x8xf32> to vector<64x8xf32>
    %6 = arith.addf %3, %5 : vector<64x8xf32>
    %cst_7 = arith.constant 5.000000e-01 : f32
    %7 = vector.broadcast %cst_7 : f32 to vector<64x8xf32>
    %8 = arith.mulf %6, %7 : vector<64x8xf32>
    %cst_8 = arith.constant 0.707106769 : f32
    %9 = vector.broadcast %cst_8 : f32 to vector<64x8xf32>
    %10 = arith.mulf %6, %9 : vector<64x8xf32>
    %11 = math.erf %10 : vector<64x8xf32>
    %cst_9 = arith.constant 1.000000e+00 : f32
    %12 = vector.broadcast %cst_9 : f32 to vector<64x8xf32>
    %13 = arith.addf %11, %12 : vector<64x8xf32>
    %14 = arith.mulf %8, %13 : vector<64x8xf32>
    %cst_10 = arith.constant 0.000000e+00 : bf16
    %15 = vector.broadcast %cst_10 : bf16 to vector<1x1x9x8xbf16>
    %c0_11 = arith.constant 0 : index
    %c8 = arith.constant 8 : index
    %c0_12 = arith.constant 0 : index
    %c0_13 = arith.constant 0 : index
    %16 = vector.load %arg7[%c0_11, %c8, %c0_12, %c0_13] : memref<1x9x9x8xbf16, #tpu.memory_space<vmem>>, vector<1x1x9x8xbf16>
    tpu.vector_store %arg7[%c0_11, %c8, %c0_12, %c0_13], %15 {strides = array<i32>} : memref<1x9x9x8xbf16, #tpu.memory_space<vmem>>, vector<1x1x9x8xbf16>,
    %cst_14 = arith.constant 0.000000e+00 : bf16
    %17 = vector.broadcast %cst_14 : bf16 to vector<1x9x1x8xbf16>
    %c0_15 = arith.constant 0 : index
    %c0_16 = arith.constant 0 : index
    %c8_17 = arith.constant 8 : index
    %c0_18 = arith.constant 0 : index
    %18 = vector.load %arg7[%c0_15, %c0_16, %c8_17, %c0_18] : memref<1x9x9x8xbf16, #tpu.memory_space<vmem>>, vector<1x9x1x8xbf16>
    tpu.vector_store %arg7[%c0_15, %c0_16, %c8_17, %c0_18], %17 {strides = array<i32>} : memref<1x9x9x8xbf16, #tpu.memory_space<vmem>>, vector<1x9x1x8xbf16>,
    %19 = arith.truncf %14 : vector<64x8xf32> to vector<64x8xbf16>
    %20 = vector.shape_cast %19 : vector<64x8xbf16> to vector<1x8x8x8xbf16>
    %c0_19 = arith.constant 0 : index
    %c0_20 = arith.constant 0 : index
    %c0_21 = arith.constant 0 : index
    %c0_22 = arith.constant 0 : index
    %21 = vector.load %arg7[%c0_19, %c0_20, %c0_21, %c0_22] : memref<1x9x9x8xbf16, #tpu.memory_space<vmem>>, vector<1x8x8x8xbf16>
    tpu.vector_store %arg7[%c0_19, %c0_20, %c0_21, %c0_22], %20 {strides = array<i32>} : memref<1x9x9x8xbf16, #tpu.memory_space<vmem>>, vector<1x8x8x8xbf16>,
    %cst_23 = arith.constant 0.000000e+00 : f32
    %22 = vector.broadcast %cst_23 : f32 to vector<64x16xf32>
    %c0_24 = arith.constant 0 : index
    %c0_25 = arith.constant 0 : index
    %c0_26 = arith.constant 0 : index
    %c0_27 = arith.constant 0 : index
    %23 = vector.load %arg7[%c0_24, %c0_25, %c0_26, %c0_27] : memref<1x9x9x8xbf16, #tpu.memory_space<vmem>>, vector<1x8x8x8xbf16>
    %24 = vector.shape_cast %23 : vector<1x8x8x8xbf16> to vector<64x8xbf16>
    %c0_28 = arith.constant 0 : index
    %c0_29 = arith.constant 0 : index
    %c0_30 = arith.constant 0 : index
    %25 = vector.load %arg4[%c0_28, %c0_29, %c0_30] : memref<4x8x16xbf16, #tpu.memory_space<vmem>>, vector<1x8x16xbf16>
    %26 = vector.shape_cast %25 : vector<1x8x16xbf16> to vector<8x16xbf16>
    %cst_31 = arith.constant dense<0.000000e+00> : vector<64x16xf32>
    %27 = tpu.matmul %24, %26, %cst_31 {dimension_numbers = #tpu.dot_dimension_numbers<[1], [0], [0], [1], [0, 0, 1, 1], [], []>} : vector<64x8xbf16>, vector<8x16xbf16>, vector<64x16xf32> -> vector<64x16xf32>
    %28 = arith.addf %22, %27 : vector<64x16xf32>
    %c0_32 = arith.constant 0 : index
    %c0_33 = arith.constant 0 : index
    %c1 = arith.constant 1 : index
    %c0_34 = arith.constant 0 : index
    %29 = vector.load %arg7[%c0_32, %c0_33, %c1, %c0_34] : memref<1x9x9x8xbf16, #tpu.memory_space<vmem>>, vector<1x8x8x8xbf16>
    %30 = vector.shape_cast %29 : vector<1x8x8x8xbf16> to vector<64x8xbf16>
    %c1_35 = arith.constant 1 : index
    %c0_36 = arith.constant 0 : index
    %c0_37 = arith.constant 0 : index
    %31 = vector.load %arg4[%c1_35, %c0_36, %c0_37] : memref<4x8x16xbf16, #tpu.memory_space<vmem>>, vector<1x8x16xbf16>
    %32 = vector.shape_cast %31 : vector<1x8x16xbf16> to vector<8x16xbf16>
    %cst_38 = arith.constant dense<0.000000e+00> : vector<64x16xf32>
    %33 = tpu.matmul %30, %32, %cst_38 {dimension_numbers = #tpu.dot_dimension_numbers<[1], [0], [0], [1], [0, 0, 1, 1], [], []>} : vector<64x8xbf16>, vector<8x16xbf16>, vector<64x16xf32> -> vector<64x16xf32>
    %34 = arith.addf %28, %33 : vector<64x16xf32>
    %c0_39 = arith.constant 0 : index
    %c1_40 = arith.constant 1 : index
    %c0_41 = arith.constant 0 : index
    %c0_42 = arith.constant 0 : index
    %35 = vector.load %arg7[%c0_39, %c1_40, %c0_41, %c0_42] : memref<1x9x9x8xbf16, #tpu.memory_space<vmem>>, vector<1x8x8x8xbf16>
    %36 = vector.shape_cast %35 : vector<1x8x8x8xbf16> to vector<64x8xbf16>
    %c2 = arith.constant 2 : index
    %c0_43 = arith.constant 0 : index
    %c0_44 = arith.constant 0 : index
    %37 = vector.load %arg4[%c2, %c0_43, %c0_44] : memref<4x8x16xbf16, #tpu.memory_space<vmem>>, vector<1x8x16xbf16>
    %38 = vector.shape_cast %37 : vector<1x8x16xbf16> to vector<8x16xbf16>
    %cst_45 = arith.constant dense<0.000000e+00> : vector<64x16xf32>
    %39 = tpu.matmul %36, %38, %cst_45 {dimension_numbers = #tpu.dot_dimension_numbers<[1], [0], [0], [1], [0, 0, 1, 1], [], []>} : vector<64x8xbf16>, vector<8x16xbf16>, vector<64x16xf32> -> vector<64x16xf32>
    %40 = arith.addf %34, %39 : vector<64x16xf32>
    %c0_46 = arith.constant 0 : index
    %c1_47 = arith.constant 1 : index
    %c1_48 = arith.constant 1 : index
    %c0_49 = arith.constant 0 : index
    %41 = vector.load %arg7[%c0_46, %c1_47, %c1_48, %c0_49] : memref<1x9x9x8xbf16, #tpu.memory_space<vmem>>, vector<1x8x8x8xbf16>
    %42 = vector.shape_cast %41 : vector<1x8x8x8xbf16> to vector<64x8xbf16>
    %c3 = arith.constant 3 : index
    %c0_50 = arith.constant 0 : index
    %c0_51 = arith.constant 0 : index
    %43 = vector.load %arg4[%c3, %c0_50, %c0_51] : memref<4x8x16xbf16, #tpu.memory_space<vmem>>, vector<1x8x16xbf16>
    %44 = vector.shape_cast %43 : vector<1x8x16xbf16> to vector<8x16xbf16>
    %cst_52 = arith.constant dense<0.000000e+00> : vector<64x16xf32>
    %45 = tpu.matmul %42, %44, %cst_52 {dimension_numbers = #tpu.dot_dimension_numbers<[1], [0], [0], [1], [0, 0, 1, 1], [], []>} : vector<64x8xbf16>, vector<8x16xbf16>, vector<64x16xf32> -> vector<64x16xf32>
    %46 = arith.addf %40, %45 : vector<64x16xf32>
    %47 = vector.shape_cast %46 : vector<64x16xf32> to vector<1x8x8x16xf32>
    %c0_53 = arith.constant 0 : index
    %c0_54 = arith.constant 0 : index
    %c0_55 = arith.constant 0 : index
    %48 = vector.load %arg5[%c0_53, %c0_54, %c0_55] : memref<8x8x16xf32, #tpu.memory_space<vmem>>, vector<8x8x16xf32>
    %49 = vector.shape_cast %48 : vector<8x8x16xf32> to vector<1x8x8x16xf32>
    %50 = arith.addf %47, %49 : vector<1x8x8x16xf32>
    %c0_56 = arith.constant 0 : index
    %c0_57 = arith.constant 0 : index
    %c0_58 = arith.constant 0 : index
    %c0_59 = arith.constant 0 : index
    %51 = vector.load %arg6[%c0_56, %c0_57, %c0_58, %c0_59] : memref<1x8x8x16xf32, #tpu.memory_space<vmem>>, vector<1x8x8x16xf32>
    tpu.vector_store %arg6[%c0_56, %c0_57, %c0_58, %c0_59], %50 {strides = array<i32>} : memref<1x8x8x16xf32, #tpu.memory_space<vmem>>, vector<1x8x8x16xf32>,
    return
  }
  func.func @transform_0(%arg0: i32) -> (i32, i32, i32, i32) {
    %c0_i32 = arith.constant 0 : i32
    %c0_i32_0 = arith.constant 0 : i32
    %c0_i32_1 = arith.constant 0 : i32
    %c0_i32_2 = arith.constant 0 : i32
    return %arg0, %c0_i32, %c0_i32_0, %c0_i32_1 : i32, i32, i32, i32
  }
  func.func @transform_1(%arg0: i32) -> (i32, i32) {
    %c0_i32 = arith.constant 0 : i32
    %c0_i32_0 = arith.constant 0 : i32
    %c0_i32_1 = arith.constant 0 : i32
    return %c0_i32, %c0_i32_0 : i32, i32
  }
  func.func @transform_2(%arg0: i32) -> (i32, i32) {
    %c0_i32 = arith.constant 0 : i32
    %c0_i32_0 = arith.constant 0 : i32
    %c0_i32_1 = arith.constant 0 : i32
    return %c0_i32, %c0_i32_0 : i32, i32
  }
  func.func @transform_3(%arg0: i32) -> (i32, i32, i32) {
    %c0_i32 = arith.constant 0 : i32
    %c0_i32_0 = arith.constant 0 : i32
    %c0_i32_1 = arith.constant 0 : i32
    %c0_i32_2 = arith.constant 0 : i32
    return %c0_i32, %c0_i32_0, %c0_i32_1 : i32, i32, i32
  }
  func.func @transform_4(%arg0: i32) -> (i32, i32, i32) {
    %c0_i32 = arith.constant 0 : i32
    %c0_i32_0 = arith.constant 0 : i32
    %c0_i32_1 = arith.constant 0 : i32
    %c0_i32_2 = arith.constant 0 : i32
    return %c0_i32, %c0_i32_0, %c0_i32_1 : i32, i32, i32
  }
  func.func @transform_5(%arg0: i32) -> (i32, i32, i32, i32) {
    %c0_i32 = arith.constant 0 : i32
    %c0_i32_0 = arith.constant 0 : i32
    %c0_i32_1 = arith.constant 0 : i32
    %c0_i32_2 = arith.constant 0 : i32
    return %arg0, %c0_i32, %c0_i32_0, %c0_i32_1 : i32, i32, i32, i32
  }
}

</mosaic_0001>

<bundles_post_ra>
// kernel: forward.1
= control target key start
LH: loop header
LB: loop body
LE: loop exit
PB: predicated region body
PF: predicated region fallthrough
CT: control target
= control target key end

     0   :  { %s1547_s18 = smov 0   ;;  %s2014_s0 = inlined_call_operand.vmem [shape: bf16[2,8,8,72], index: 0, kind: input, shape index: {}]   ;;  %s2015_s1 = inlined_call_operand.vmem [shape: bf16[72,8], index: 1, kind: input, shape index: {}]   ;;  %s2016_s2 = inlined_call_operand.vmem [shape: f32[1,8], index: 2, kind: input, shape index: {}]   ;;  %s2017_s3 = inlined_call_operand.vmem [shape: bf16[4,8,16], index: 3, kind: input, shape index: {}]   ;;  %s2018_s4 = inlined_call_operand.vmem [shape: f32[8,8,16], index: 4, kind: input, shape index: {}]   ;;  %s2019_s5 = inlined_call_operand.vmem [shape: f32[2,8,8,16], index: 5, kind: output, shape index: {}]  }
   0x1 LB: > { %s1356_s19 = sadd.s32 4294967295, %s1514_s18   ;;  %p1360_p0 = scmp.ge.s32.totalorder %s1514_s18, 1  ;;  %s1514_s18 = sphi %s1547_s18, %s15_s18  }
   0x2   : > { %p187_p1 = scmp.lt.s32.totalorder %s1514_s18, 3 }
   0x4   : > { %p188_p2 = pnand %p1360_p0, %p187_p1 }
   0x5   : > { %p215_p3 = scmp.lt.s32.totalorder (!%p188_p2), %s1356_s19, 1 }
   0x6   : > { %191 = sbr.rel (%p188_p2) target bundleno = 525 (0x20d), region = 40 }
   0xb   : > { %v242_v0 = vld [vmem:[%s2015_s1 + $0x20] sm:$0xf]  ;;  %vm307_vm0 = vcmask 1043456   ;;  %v1471_v4 = vld [vmem:[%s2015_s1 + $0x18] sm:$0xff]  ;;  %v1470_v5 = vld [vmem:[%s2015_s1 + $0x10] sm:$0xff]  ;;  %s2039_s19 = smov (!%p215_p3, %s1356_s19), 1 }
   0xc   : > { %v284_v1 = vunpack.c.l.b16 %v242_v0  ;;  %v1469_v6 = vld [vmem:[%s2015_s1 + $0x8] sm:$0xff]  ;;  %s1462_s28 = sshll.u32 %s2039_s19, 5  ;;  %v1468_v7 = vld [vmem:[%s2015_s1] sm:$0xff]  ;;  %vm294_vm1 = vcmask 588800   ;;  %vm693_vm6 = vcmask 60416   ;;  %s1463_s21 = sshll.u32 %s2039_s19, 6 }
   0xd   : > { %s219_s8 = scalar_lea.vmem %s2014_s0, %s1462_s28  ;;  %v1580_v12 = vld [vmem:[%s2016_s2] ss:$0 sm:$0xff]  ;;  %s1971_s26 = scalar_lea.vmem %s2019_s5, %s1463_s21 }
   0xe   : > { %v289_v2 = vpack.c.b16 %v284_v1, %v284_v1  ;;  %v1464_v8 = vld [vmem:[%s219_s8] sm:$0xff]  ;;  %v1465_v9 = vld [vmem:[%s219_s8 + $0x8] sm:$0xff]  ;;  %v1466_v10 = vld [vmem:[%s219_s8 + $0x10] sm:$0xff] }
   0xf   : > { %v1467_v11 = vld [vmem:[%s219_s8 + $0x18] sm:$0xff] }
  0x10   : > { %v309_v3 = vsel %vm307_vm0, %v289_v2, 0 }
  0x11   : > { %314 = vmatpush.bf16.msra.mxu0 %v309_v3 }
  0x15   : > { %315 = vmatpush.bf16.msra.mxu0 %v1471_v4 }
  0x19   : > { %316 = vmatpush.bf16.msra.mxu0 %v1470_v5 }
  0x1d   : > { %317 = vmatpush.bf16.msra.mxu0 %v1469_v6 }
  0x21   : > { %318 = vmatpush.bf16.msra.mxu0 %v1468_v7 }
  0x24   : > { %1397 = vmatmul.msk.bf16.vlgmr.msra.gmra.mxu0 %vm294_vm1, %v1464_v8 }
  0x34   : > { %1398 = vmatmul.msk.bf16.gmra.mxu0 %vm294_vm1, %v1465_v9 }
  0x44   : > { %1399 = vmatmul.msk.bf16.gmra.mxu0 %vm294_vm1, %v1466_v10 }
  0x54   : > { %1400 = vmatmul.msk.bf16.gmra.mxu0 %vm294_vm1, %v1467_v11  ;;  %vm695_vm1 = vcmask 57344  }
  0xa1   : > { %v320_v13 = vpop.f32.mrf.mxu0 }
  0xa2   : > { %v321_v14 = vadd.f32 %v1580_v12, %v320_v13 }
  0xa4   : > { %v1583_v15 = vmul.f32 0.70710677, %v321_v14  ;;  %v1608_v8 = vmul.f32 0.5, %v321_v14 }
  0xa6   : > { %v356_v16 = vmul.f32 %v1583_v15, %v1583_v15 }
  0xa8   : > { %v357_v17 = vmin.f32 %v356_v16, 16.0 }
  0xa9   : > { %v322_v18 = vpop.f32.mrf.mxu0 }
  0xaa   : > { %v358_v19 = vmul.f32 2.1237322e-06, %v357_v17  ;;  %v369_v20 = vmul.f32 3.8918573e-05, %v357_v17  ;;  %v323_v21 = vadd.f32 %v1580_v12, %v322_v18 }
  0xac   : > { %v359_v22 = vadd.f32 0.00028619796, %v358_v19  ;;  %v370_v23 = vadd.f32 0.001143296, %v369_v20  ;;  %v1588_v24 = vmul.f32 0.70710677, %v323_v21 }
  0xad   : > { %v1616_v16 = vmul.f32 0.5, %v323_v21 }
  0xae   : > { %v360_v25 = vmul.f32 %v359_v22, %v357_v17  ;;  %v371_v26 = vmul.f32 %v370_v23, %v357_v17  ;;  %v396_v27 = vmul.f32 %v1588_v24, %v1588_v24 }
  0xb0   : > { %v361_v28 = vadd.f32 0.0036580483, %v360_v25  ;;  %v372_v29 = vadd.f32 0.014752088, %v371_v26  ;;  %v397_v30 = vmin.f32 %v396_v27, 16.0 }
  0xb1   : > { %v325_v31 = vpop.f32.mrf.mxu0 }
  0xb2   : > { %v362_v32 = vmul.f32 %v361_v28, %v357_v17  ;;  %v373_v33 = vmul.f32 %v372_v29, %v357_v17  ;;  %v326_v34 = vadd.f32 %v1580_v12, %v325_v31  ;;  %v398_v35 = vmul.f32 2.1237322e-06, %v397_v30 }
  0xb3   : > { %v409_v36 = vmul.f32 3.8918573e-05, %v397_v30 }
  0xb4   : > { %v363_v37 = vadd.f32 0.05243302, %v362_v32  ;;  %v374_v38 = vadd.f32 0.112945676, %v373_v33  ;;  %v399_v39 = vadd.f32 0.00028619796, %v398_v35 }
  0xb5   : > { %v410_v40 = vadd.f32 0.001143296, %v409_v36  ;;  %v1593_v42 = vmul.f32 0.70710677, %v326_v34  ;;  %v1625_v28 = vmul.f32 0.5, %v326_v34 }
  0xb6   : > { %v375_v41 = vmul.f32 %v374_v38, %v357_v17  ;;  %v364_v43 = vmul.f32 %v363_v37, %v357_v17  ;;  %v400_v44 = vmul.f32 %v399_v39, %v397_v30 }
  0xb7   : > { %v411_v45 = vmul.f32 %v410_v40, %v397_v30  ;;  %v436_v47 = vmul.f32 %v1593_v42, %v1593_v42 }
  0xb8   : > { %v376_v46 = vadd.f32 0.4994258, %v375_v41  ;;  %v401_v48 = vadd.f32 0.0036580483, %v400_v44  ;;  %v365_v53 = vadd.f32 0.18741608, %v364_v43 }
  0xb9   : > { %v412_v49 = vadd.f32 0.014752088, %v411_v45  ;;  %v327_v50 = vpop.f32.mrf.mxu0  ;;  %v1597_v52 = vmin.f32 %v436_v47, 16.0 }
  0xba   : > { %v377_v51 = vmul.f32 %v376_v46, %v357_v17  ;;  %v402_v54 = vmul.f32 %v401_v48, %v397_v30  ;;  %v1601_v58 = vadd.f32 %v1580_v12, %v327_v50  ;;  %v366_v62 = vmul.f32 %v365_v53, %v357_v17 }
  0xbb   : > { %v413_v55 = vmul.f32 %v412_v49, %v397_v30  ;;  %v438_v57 = vmul.f32 2.1237322e-06, %v1597_v52  ;;  %v449_v61 = vmul.f32 3.8918573e-05, %v1597_v52 }
  0xbc   : > { %v378_v56 = vadd.f32 1.0, %v377_v51  ;;  %v403_v59 = vadd.f32 0.05243302, %v402_v54  ;;  %v1605_v3 = vmul.f32 0.70710677, %v1601_v58 }
  0xbd   : > { %v414_v60 = vadd.f32 0.112945676, %v413_v55  ;;  %v439_v1 = vadd.f32 0.00028619796, %v438_v57  ;;  %v450_v2 = vadd.f32 0.001143296, %v449_v61 }
  0xbe   : > { %1492 = vrcp.f32 %v378_v56  ;;  %v404_v63 = vmul.f32 %v403_v59, %v397_v30  ;;  %v476_v10 = vmul.f32 %v1605_v3, %v1605_v3  ;;  %v367_v13 = vadd.f32 1.1283791, %v366_v62 }
  0xbf   : > { %v415_v0 = vmul.f32 %v414_v60, %v397_v30  ;;  %v440_v6 = vmul.f32 %v439_v1, %v1597_v52  ;;  %v451_v9 = vmul.f32 %v450_v2, %v1597_v52  ;;  %v388_v26 = vand.u32 2147483647, %v378_v56 }
  0xc0   : > { %v405_v4 = vadd.f32 0.18741608, %v404_v63  ;;  %v1618_v23 = vmin.f32 %v476_v10, 16.0  ;;  %v368_v32 = vmul.f32 %v367_v13, %v1583_v15  ;;  %v390_v35 = vand.u32 2147483648, %v378_v56 }
  0xc1   : > { %v416_v5 = vadd.f32 0.4994258, %v415_v0  ;;  %v330_v7 = vpop.f32.mrf.mxu0  ;;  %v441_v18 = vadd.f32 0.0036580483, %v440_v6  ;;  %v452_v22 = vadd.f32 0.014752088, %v451_v9  ;;  %vm384_vm3 = vweird.f32 %v378_v56 }
  0xc2   : > { %v1614_v11 = vadd.f32 %v1580_v12, %v330_v7  ;;  %v406_v20 = vmul.f32 %v405_v4, %v397_v30  ;;  %v478_v31 = vmul.f32 2.1237322e-06, %v1618_v23  ;;  %vm1635_vm4 = vcmp.eq.f32.partialorder %v388_v26, 8.507059e+37 }
  0xc3   : > { %v417_v17 = vmul.f32 %v416_v5, %v397_v30  ;;  %v442_v29 = vmul.f32 %v441_v18, %v1597_v52  ;;  %v453_v21 = vmul.f32 %v452_v22, %v1597_v52  ;;  %v489_v30 = vmul.f32 3.8918573e-05, %v1618_v23 }
  0xc4   : > { %v1493_v19 = vpop.eup %1492  ;;  %v1621_v14 = vmul.f32 0.70710677, %v1614_v11  ;;  %v407_v36 = vadd.f32 1.1283791, %v406_v20  ;;  %v479_v40 = vadd.f32 0.00028619796, %v478_v31 }
  0xc5   : > { %v380_v25 = vmul.f32 %v1493_v19, %v378_v56  ;;  %v1623_v27 = vadd.f32 1.0, %v417_v17  ;;  %vm385_vm2 = vweird.f32 %v1493_v19  ;;  %v443_v37 = vadd.f32 0.05243302, %v442_v29 }
  0xc6   : > { %v516_v34 = vmul.f32 %v1621_v14, %v1621_v14  ;;  %v454_v39 = vadd.f32 0.112945676, %v453_v21  ;;  %v490_v41 = vadd.f32 0.001143296, %v489_v30  ;;  %v480_v47 = vmul.f32 %v479_v40, %v1618_v23  ;;  %vm386_vm5 = vmor %vm384_vm3, %vm385_vm2 }
  0xc7   : > { %v381_v33 = vsub.f32 1.0, %v380_v25  ;;  %1494 = vrcp.f32 %v1623_v27  ;;  %v444_v15 = vmul.f32 %v443_v37, %v1597_v52  ;;  %v391_v49 = vor.u32 1.1754944e-38, %v390_v35 }
  0xc8   : > { %v1640_v44 = vmin.f32 %v516_v34, 16.0  ;;  %v455_v46 = vmul.f32 %v454_v39, %v1597_v52  ;;  %v491_v48 = vmul.f32 %v490_v41, %v1618_v23  ;;  %v408_v50 = vmul.f32 %v407_v36, %v1588_v24 }
  0xc9   : > { %v382_v38 = vmul.f32 %v1493_v19, %v381_v33  ;;  %v428_v51 = vand.u32 2147483647, %v1623_v27  ;;  %v481_v57 = vadd.f32 0.0036580483, %v480_v47  ;;  %v332_v60 = vpop.f32.mrf.mxu0  ;;  %v445_v63 = vadd.f32 0.18741608, %v444_v15 }
  0xca   : > { %v518_v53 = vmul.f32 2.1237322e-06, %v1640_v44  ;;  %v456_v56 = vadd.f32 0.4994258, %v455_v46  ;;  %v492_v59 = vadd.f32 0.014752088, %v491_v48  ;;  %vm424_vm8 = vweird.f32 %v1623_v27 }
  0xcb   : > { %v383_v45 = vadd.f32 %v1493_v19, %v382_v38  ;;  %v529_v0 = vmul.f32 3.8918573e-05, %v1640_v44  ;;  %v482_v2 = vmul.f32 %v481_v57, %v1618_v23  ;;  %v430_v6 = vand.u32 2147483648, %v1623_v27 }
  0xcc   : > { %v457_v1 = vmul.f32 %v456_v56, %v1597_v52  ;;  %v493_v4 = vmul.f32 %v492_v59, %v1618_v23  ;;  %v519_v7 = vadd.f32 0.00028619796, %v518_v53  ;;  %vm1662_vm9 = vcmp.eq.f32.partialorder %v428_v51, 8.507059e+37 }
  0xcd   : > { %v1495_v54 = vpop.eup %1494  ;;  %v387_v55 = vsel %vm386_vm5, %v1493_v19, %v383_v45  ;;  %v483_v13 = vadd.f32 0.05243302, %v482_v2  ;;  %v446_v19 = vmul.f32 %v445_v63, %v1597_v52  ;;  %v530_v22 = vadd.f32 0.001143296, %v529_v0 }
  0xce   : > { %v392_v61 = vsel %vm1635_vm4, %v391_v49, %v387_v55  ;;  %v420_v62 = vmul.f32 %v1495_v54, %v1623_v27  ;;  %vm425_vm7 = vweird.f32 %v1495_v54  ;;  %v1657_v10 = vadd.f32 1.0, %v457_v1 }
  0xcf   : > { %v393_v24 = vmul.f32 %v392_v61, %v368_v32  ;;  %v494_v17 = vadd.f32 0.112945676, %v493_v4  ;;  %v520_v20 = vmul.f32 %v519_v7, %v1640_v44  ;;  %v484_v21 = vmul.f32 %v483_v13, %v1618_v23  ;;  %vm426_vm10 = vmor %vm424_vm8, %vm425_vm7 }
  0xd0   : > { %v421_v5 = vsub.f32 1.0, %v420_v62  ;;  %1496 = vrcp.f32 %v1657_v10  ;;  %v1670_v30 = vadd.f32 %v1580_v12, %v332_v60  ;;  %v431_v32 = vor.u32 1.1754944e-38, %v430_v6 }
  0xd1   : > { %v1401_v9 = vclamps-f32 %v393_v24, 1.0  ;;  %v495_v31 = vmul.f32 %v494_v17, %v1618_v23  ;;  %v521_v27 = vadd.f32 0.0036580483, %v520_v20  ;;  %v531_v33 = vmul.f32 %v530_v22, %v1640_v44  ;;  %v335_v43 = vpop.f32.mrf.mxu0 }
  0xd2   : > { %v422_v18 = vmul.f32 %v1495_v54, %v421_v5  ;;  %v447_v36 = vadd.f32 1.1283791, %v446_v19  ;;  %v485_v37 = vadd.f32 0.18741608, %v484_v21  ;;  %v1683_v46 = vmul.f32 0.70710677, %v1670_v30 }
  0xd3   : > { %v676_v25 = vadd.f32 1.0, %v1401_v9  ;;  %v496_v34 = vadd.f32 0.4994258, %v495_v31  ;;  %v522_v40 = vmul.f32 %v521_v27, %v1640_v44  ;;  %v532_v41 = vadd.f32 0.014752088, %v531_v33 }
  0xd4   : > { %v423_v29 = vadd.f32 %v1495_v54, %v422_v18  ;;  %v468_v48 = vand.u32 2147483647, %v1657_v10  ;;  %v486_v49 = vmul.f32 %v485_v37, %v1618_v23  ;;  %v1692_v55 = vadd.f32 %v1580_v12, %v335_v43 }
  0xd5   : > { %v684_v52 = vmul.f32 %v676_v25, %v1608_v8  ;;  %v1679_v8 = vmul.f32 0.5, %v1601_v58  ;;  %v497_v45 = vmul.f32 %v496_v34, %v1618_v23  ;;  %v523_v51 = vadd.f32 0.05243302, %v522_v40 }
  0xd6   : > { %v427_v35 = vsel %vm426_vm10, %v1495_v54, %v423_v29  ;;  %v1497_v47 = vpop.eup %1496  ;;  %v533_v53 = vmul.f32 %v532_v41, %v1640_v44  ;;  %v556_v60 = vmul.f32 %v1683_v46, %v1683_v46  ;;  %vm464_vm11 = vweird.f32 %v1657_v10 }
  0xd7   : > { %v728_v38 = vpack.c.bf16 %v684_v52, %v684_v52  ;;  %v432_v39 = vsel %vm1662_vm9, %v431_v32, %v427_v35  ;;  %v460_v58 = vmul.f32 %v1497_v47, %v1657_v10  ;;  %v1694_v56 = vadd.f32 1.0, %v497_v45 }
  0xd8   : > { %v433_v15 = vmul.f32 %v432_v39, %v408_v50  ;;  %v448_v50 = vmul.f32 %v447_v36, %v1593_v42  ;;  %v524_v57 = vmul.f32 %v523_v51, %v1640_v44  ;;  %v534_v59 = vadd.f32 0.112945676, %v533_v53 }
  0xd9   : > { %736 = vst.msk [vmem:[#allocation2] sm:$0xf] %vm693_vm6, %v728_v38  ;;  %v461_v61 = vsub.f32 1.0, %v460_v58  ;;  %v470_v62 = vand.u32 2147483648, %v1657_v10  ;;  %vm465_vm12 = vweird.f32 %v1497_v47  ;;  %vm1701_vm13 = vcmp.eq.f32.partialorder %v468_v48, 8.507059e+37  ;;  %v337_v27 = vpop.f32.mrf.mxu0 }
  0xda   : > { %v1402_v54 = vclamps-f32 %v433_v15, 1.0  ;;  %v487_v63 = vadd.f32 1.1283791, %v486_v49  ;;  %1498 = vrcp.f32 %v1694_v56  ;;  %v525_v1 = vadd.f32 0.18741608, %v524_v57  ;;  %vm466_vm14 = vmor %vm464_vm11, %vm465_vm12 }
  0xdb   : > { %v462_v24 = vmul.f32 %v1497_v47, %v461_v61  ;;  %v535_v2 = vmul.f32 %v534_v59, %v1640_v44  ;;  %v508_v4 = vand.u32 2147483647, %v1694_v56  ;;  %v510_v5 = vand.u32 2147483648, %v1694_v56 }
  0xdc   : > { %v677_v23 = vadd.f32 1.0, %v1402_v54  ;;  %v1710_v6 = vmin.f32 %v556_v60, 16.0  ;;  %v1713_v7 = vmul.f32 0.70710677, %v1692_v55  ;;  %v526_v17 = vmul.f32 %v525_v1, %v1640_v44 }
  0xdd   : > { %v463_v13 = vadd.f32 %v1497_v47, %v462_v24  ;;  %v536_v18 = vadd.f32 0.4994258, %v535_v2  ;;  %v488_v26 = vmul.f32 %v487_v63, %v1605_v3  ;;  %vm504_vm15 = vweird.f32 %v1694_v56 }
  0xde   : > { %v685_v0 = vmul.f32 %v677_v23, %v1616_v16  ;;  %v471_v16 = vor.u32 1.1754944e-38, %v470_v62  ;;  %v558_v19 = vmul.f32 2.1237322e-06, %v1710_v6  ;;  %v569_v20 = vmul.f32 3.8918573e-05, %v1710_v6 }
  0xdf   : > { %v596_v22 = vmul.f32 %v1713_v7, %v1713_v7  ;;  %v467_v25 = vsel %vm466_vm14, %v1497_v47, %v463_v13  ;;  %v537_v29 = vmul.f32 %v536_v18, %v1640_v44  ;;  %vm1732_vm2 = vcmp.eq.f32.partialorder %v508_v4, 8.507059e+37  ;;  %v1409_v23 = vld [vmem:[%s2017_s3 + $0x4] sm:$0xf] }
  0xe0   : > { %v729_v9 = vpack.c.bf16 %v685_v0, %v685_v0  ;;  %v1499_v10 = vpop.eup %1498  ;;  %v472_v21 = vsel %vm1701_vm13, %v471_v16, %v467_v25  ;;  %v559_v31 = vadd.f32 0.00028619796, %v558_v19  ;;  %v570_v52 = vadd.f32 0.001143296, %v569_v20  ;;  %v701_v13 = vld [vmem:[#allocation2 + $0x4] sm:$0x1] }
  0xe1   : > { %v1729_v32 = vmin.f32 %v596_v22, 16.0  ;;  %v473_v33 = vmul.f32 %v472_v21, %v448_v50  ;;  %v500_v35 = vmul.f32 %v1499_v10, %v1694_v56  ;;  %v511_v3 = vor.u32 1.1754944e-38, %v510_v5 }
  0xe2   : > { %737 = vst.msk [vmem:[#allocation2 + $0x8] sm:$0xf] %vm693_vm6, %v729_v9  ;;  %v527_v37 = vadd.f32 1.1283791, %v526_v17  ;;  %v1736_v44 = vadd.f32 1.0, %v537_v29  ;;  %v560_v34 = vmul.f32 %v559_v31, %v1710_v6  ;;  %v571_v38 = vmul.f32 %v570_v52, %v1710_v6 }
  0xe3   : > { %v598_v39 = vmul.f32 2.1237322e-06, %v1729_v32  ;;  %v1403_v40 = vclamps-f32 %v473_v33, 1.0  ;;  %v501_v41 = vsub.f32 1.0, %v500_v35  ;;  %v609_v43 = vmul.f32 3.8918573e-05, %v1729_v32 }
  0xe4   : > { %v1743_v15 = vadd.f32 %v1580_v12, %v337_v27  ;;  %vm505_vm3 = vweird.f32 %v1499_v10  ;;  %1500 = vrcp.f32 %v1736_v44  ;;  %v548_v45 = vand.u32 2147483647, %v1736_v44 }
  0xe5   : > { %vm696_vm4 = vsmask.f32 256  ;;  %v678_v47 = vadd.f32 1.0, %v1403_v40  ;;  %v502_v48 = vmul.f32 %v1499_v10, %v501_v41  ;;  %v561_v49 = vadd.f32 0.0036580483, %v560_v34  ;;  %vm506_vm5 = vmor %vm504_vm15, %vm505_vm3 }
  0xe6   : > { %v572_v51 = vadd.f32 0.014752088, %v571_v38  ;;  %v1748_v53 = vmul.f32 %v527_v37, %v1621_v14  ;;  %v550_v54 = vand.u32 2147483648, %v1736_v44  ;;  %v599_v50 = vadd.f32 0.00028619796, %v598_v39  ;;  %vm1772_vm7 = vmand %vm695_vm1, %vm696_vm4 }
  0xe7   : > { %v610_v58 = vadd.f32 0.001143296, %v609_v43  ;;  %v686_v12 = vmul.f32 %v678_v47, %v1625_v28  ;;  %v503_v57 = vadd.f32 %v1499_v10, %v502_v48  ;;  %v562_v59 = vmul.f32 %v561_v49, %v1710_v6 }
  0xe8   : > { %v573_v60 = vmul.f32 %v572_v51, %v1710_v6  ;;  %v600_v14 = vmul.f32 %v599_v50, %v1729_v32  ;;  %v1763_v62 = vmul.f32 0.70710677, %v1743_v15  ;;  %v904_v28 = vsel %vm307_vm0, %v1409_v23, 0 }
  0xe9   : > { %v611_v61 = vmul.f32 %v610_v58, %v1729_v32  ;;  %v730_v42 = vpack.c.bf16 %v686_v12, %v686_v12  ;;  %v507_v63 = vsel %vm506_vm5, %v1499_v10, %v503_v57  ;;  %v563_v0 = vadd.f32 0.05243302, %v562_v59  ;;  %913 = vmatpush.bf16.msra.mxu1 %v904_v28  ;;  %1480 = vmatpush.bf16.msra.mxu2 %v904_v28 }
  0xea   : > { %v574_v24 = vadd.f32 0.112945676, %v573_v60  ;;  %v1501_v1 = vpop.eup %1500  ;;  %v512_v56 = vsel %vm1732_vm2, %v511_v3, %v507_v63  ;;  %v601_v2 = vadd.f32 0.0036580483, %v600_v14  ;;  %v636_v5 = vmul.f32 %v1763_v62, %v1763_v62  ;;  %1481 = vmatpush.bf16.msra.mxu3 %v904_v28 }
  0xeb   : > { %v612_v4 = vadd.f32 0.014752088, %v611_v61  ;;  %738 = vst.msk [vmem:[#allocation2 + $0x10] sm:$0xf] %vm693_vm6, %v730_v42  ;;  %v513_v17 = vmul.f32 %v512_v56, %v488_v26  ;;  %v540_v18 = vmul.f32 %v1501_v1, %v1736_v44  ;;  %v551_v16 = vor.u32 1.1754944e-38, %v550_v54 }
  0xec   : > { %v564_v19 = vmul.f32 %v563_v0, %v1710_v6  ;;  %v575_v20 = vmul.f32 %v574_v24, %v1710_v6  ;;  %v602_v22 = vmul.f32 %v601_v2, %v1729_v32  ;;  %v1782_v29 = vmin.f32 %v636_v5, 16.0  ;;  %v704_v26 = vld [vmem:[#allocation2 + $0xc] sm:$0x1]  ;;  %v744_v61 = vld [vmem:[#allocation2] sm:$0xf] }
  0xed   : > { %v613_v25 = vmul.f32 %v612_v4, %v1729_v32  ;;  %v1404_v10 = vclamps-f32 %v513_v17, 1.0  ;;  %v541_v21 = vsub.f32 1.0, %v540_v18  ;;  %v702_v52 = vsel %vm1772_vm7, 0, %v701_v13 }
  0xee   : > { %v565_v31 = vadd.f32 0.18741608, %v564_v19  ;;  %vm544_vm8 = vweird.f32 %v1736_v44  ;;  %v576_v27 = vadd.f32 0.4994258, %v575_v20  ;;  %v603_v33 = vadd.f32 0.05243302, %v602_v22 }
  0xef   : > { %v614_v35 = vadd.f32 0.112945676, %v613_v25  ;;  %v679_v36 = vadd.f32 1.0, %v1404_v10  ;;  %v542_v3 = vmul.f32 %v1501_v1, %v541_v21  ;;  %vm545_vm9 = vweird.f32 %v1501_v1  ;;  %703 = vst [vmem:[#allocation2 + $0x4] sm:$0x1] %v702_v52 }
  0xf0   : > { %v638_v37 = vmul.f32 2.1237322e-06, %v1782_v29  ;;  %v566_v34 = vmul.f32 %v565_v31, %v1710_v6  ;;  %v577_v38 = vmul.f32 %v576_v27, %v1710_v6  ;;  %v604_v39 = vmul.f32 %v603_v33, %v1729_v32  ;;  %vm546_vm10 = vmor %vm544_vm8, %vm545_vm9  ;;  %v745_v20 = vld [vmem:[#allocation2 + $0x8] sm:$0xf] }
  0xf1   : > { %v615_v40 = vmul.f32 %v614_v35, %v1729_v32  ;;  %v687_v41 = vmul.f32 %v679_v36, %v1679_v8  ;;  %v543_v43 = vadd.f32 %v1501_v1, %v542_v3  ;;  %v649_v48 = vmul.f32 3.8918573e-05, %v1782_v29 }
  0xf2   : > { %v639_v47 = vadd.f32 0.00028619796, %v638_v37  ;;  %v1796_v49 = vadd.f32 1.0, %v577_v38  ;;  %v605_v51 = vadd.f32 0.18741608, %v604_v39  ;;  %v705_v6 = vsel %vm1772_vm7, 0, %v704_v26 }
  0xf3   : > { %v616_v54 = vadd.f32 0.4994258, %v615_v40  ;;  %v731_v50 = vpack.c.bf16 %v687_v41, %v687_v41  ;;  %v547_v58 = vsel %vm546_vm10, %v1501_v1, %v543_v43  ;;  %vm549_vm11 = vcmp.eq.f32.partialorder %v548_v45, 8.507059e+37  ;;  %706 = vst [vmem:[#allocation2 + $0xc] sm:$0x1] %v705_v6 }
  0xf4   : > { %v640_v8 = vmul.f32 %v639_v47, %v1782_v29  ;;  %v552_v12 = vsel %vm549_vm11, %v551_v16, %v547_v58  ;;  %v567_v57 = vadd.f32 1.1283791, %v566_v34  ;;  %1502 = vrcp.f32 %v1796_v49 }
  0xf5   : > { %739 = vst.msk [vmem:[#allocation2 + $0x18] sm:$0xf] %vm693_vm6, %v731_v50  ;;  %v553_v59 = vmul.f32 %v552_v12, %v1748_v53  ;;  %v590_v60 = vand.u32 2147483648, %v1796_v49  ;;  %v606_v23 = vmul.f32 %v605_v51, %v1729_v32  ;;  %v617_v14 = vmul.f32 %v616_v54, %v1729_v32 }
  0xf6   : > { %v344_v44 = vmul.f32 0.5, %v1614_v11  ;;  %v641_v45 = vadd.f32 0.0036580483, %v640_v8  ;;  %v650_v28 = vadd.f32 0.001143296, %v649_v48  ;;  %v1814_v1 = vmul.f32 0.5, %v1670_v30 }
  0xf7   : > { %v1405_v42 = vclamps-f32 %v553_v59, 1.0  ;;  %v588_v63 = vand.u32 2147483647, %v1796_v49  ;;  %v607_v0 = vadd.f32 1.1283791, %v606_v23  ;;  %v1811_v24 = vadd.f32 1.0, %v617_v14 }
  0xf8   : > { %v642_v53 = vmul.f32 %v641_v45, %v1782_v29  ;;  %v651_v56 = vmul.f32 %v650_v28, %v1782_v29  ;;  %v765_v2 = vshrl.u32 %v744_v61, 16  ;;  %v568_v4 = vmul.f32 %v567_v57, %v1683_v46  ;;  %v753_v5 = vld [vmem:[#allocation2 + $0x4] sm:$0x1]  ;;  %v707_v8 = vld [vmem:[#allocation2 + $0x14] sm:$0x1] }
  0xf9   : > { %v680_v32 = vadd.f32 1.0, %v1405_v42  ;;  %v591_v11 = vor.u32 1.1754944e-38, %v590_v60  ;;  %1504 = vrcp.f32 %v1811_v24  ;;  %vm584_vm12 = vweird.f32 %v1796_v49  ;;  %v710_v60 = vld [vmem:[#allocation2 + $0x1c] sm:$0x1]  ;;  %v1455_v45 = vld [vmem:[%s2017_s3 + $0xc] sm:$0xf] }
  0xfa   : > { %v1503_v13 = vpop.eup %1502  ;;  %v643_v17 = vadd.f32 0.05243302, %v642_v53  ;;  %vm761_vm13 = vsmask.f32 3328  ;;  %vm762_vm14 = vsmask.f32 7440  ;;  %v1827_v19 = vmul.f32 %v607_v0, %v1713_v7 }
  0xfb   : > { %v688_v30 = vmul.f32 %v680_v32, %v344_v44  ;;  %v580_v18 = vmul.f32 %v1503_v13, %v1796_v49  ;;  %vm1822_vm15 = vcmp.eq.f32.partialorder %v588_v63, 8.507059e+37  ;;  %v652_v46 = vadd.f32 0.014752088, %v651_v56  ;;  %v754_v10 = vld [vmem:[#allocation2 + $0xc] sm:$0x1]  ;;  %vm1843_vm4 = vmor %vm761_vm13, %vm762_vm14 }
  0xfc   : > { %v628_v22 = vand.u32 2147483647, %v1811_v24  ;;  %v644_v25 = vmul.f32 %v643_v17, %v1782_v29  ;;  %v767_v21 = vrot.slane %v765_v2, 4  ;;  %v768_v31 = vshll.u32 %v744_v61, 16  ;;  %v746_v0 = vld [vmem:[#allocation2 + $0x10] sm:$0xf] }
  0xfd   : > { %v732_v52 = vpack.c.bf16 %v688_v30, %v688_v30  ;;  %v581_v26 = vsub.f32 1.0, %v580_v18  ;;  %v653_v27 = vmul.f32 %v652_v46, %v1782_v29  ;;  %v774_v33 = vshll.u32 %v753_v5, 16  ;;  %v747_v5 = vld [vmem:[#allocation2 + $0x18] sm:$0xf] }
  0xfe   : > { %vm624_vm1 = vweird.f32 %v1811_v24  ;;  %v630_v35 = vand.u32 2147483648, %v1811_v24  ;;  %v770_v7 = vrot.slane %v768_v31, 5  ;;  %v779_v36 = vshrl.u32 %v745_v20, 16 }
  0xff   : > { %v782_v3 = vshll.u32 %v745_v20, 16  ;;  %v1505_v37 = vpop.eup %1504  ;;  %740 = vst.msk [vmem:[#allocation2 + $0x20] sm:$0xf] %vm693_vm6, %v732_v52  ;;  %v582_v34 = vmul.f32 %v1503_v13, %v581_v26  ;;  %vm585_vm2 = vweird.f32 %v1503_v13  ;;  %v654_v38 = vadd.f32 0.112945676, %v653_v27 }
 0x100   : > { %v788_v39 = vshll.u32 %v754_v10, 16  ;;  %v620_v40 = vmul.f32 %v1505_v37, %v1811_v24  ;;  %vm1836_vm3 = vcmp.eq.f32.partialorder %v628_v22, 8.507059e+37  ;;  %v645_v43 = vadd.f32 0.18741608, %v644_v25  ;;  %vm586_vm5 = vmor %vm584_vm12, %vm585_vm2  ;;  %v1082_v26 = vld [vmem:[#allocation2 + $0x8] sm:$0xf] }
 0x101   : > { %v771_v47 = vor.u32 %v770_v7, %v767_v21  ;;  %v776_v48 = vrot.slane %v774_v33, 5  ;;  %v583_v51 = vadd.f32 %v1503_v13, %v582_v34  ;;  %v655_v54 = vmul.f32 %v654_v38, %v1782_v29 }
 0x102   : > { %v781_v50 = vrot.slane %v779_v36, 4  ;;  %v784_v58 = vrot.slane %v782_v3, 5  ;;  %v621_v12 = vsub.f32 1.0, %v620_v40  ;;  %vm625_vm8 = vweird.f32 %v1505_v37  ;;  %v1083_v40 = vld [vmem:[#allocation2 + $0xc] sm:$0x1] }
 0x103   : > { %v631_v57 = vor.u32 1.1754944e-38, %v630_v35  ;;  %v772_v59 = vrot.slane %v771_v47, 4  ;;  %v587_v23 = vsel %vm586_vm5, %v1503_v13, %v583_v51  ;;  %v656_v14 = vadd.f32 0.4994258, %v655_v54  ;;  %vm626_vm9 = vmor %vm624_vm1, %vm625_vm8 }
 0x104   : > { %v785_v61 = vor.u32 %v784_v58, %v781_v50  ;;  %v790_v44 = vrot.slane %v788_v39, 5  ;;  %v592_v28 = vsel %vm1822_vm15, %v591_v11, %v587_v23  ;;  %v622_v42 = vmul.f32 %v1505_v37, %v621_v12 }
 0x105   : > { %v646_v49 = vmul.f32 %v645_v43, %v1782_v29  ;;  %v777_v63 = vsel %vm1843_vm4, %v772_v59, %v776_v48  ;;  %v593_v53 = vmul.f32 %v592_v28, %v568_v4  ;;  %v657_v56 = vmul.f32 %v656_v14, %v1782_v29 }
 0x106   : > { %v786_v2 = vrot.slane %v785_v61, 4  ;;  %v878_v32 = vunpack.c.l.b16 %v777_v63  ;;  %v623_v13 = vadd.f32 %v1505_v37, %v622_v42  ;;  %v1237_v17 = vsel %vm307_vm0, %v1455_v45, 0 }
 0x107   : > { %v708_v30 = vsel %vm1772_vm7, 0, %v707_v8  ;;  %v711_v11 = vsel %vm1772_vm7, 0, %v710_v60  ;;  %v1406_v18 = vclamps-f32 %v593_v53, 1.0  ;;  %v1866_v4 = vadd.f32 1.0, %v657_v56  ;;  %1246 = vmatpush.bf16.msrb.mxu1 %v1237_v17  ;;  %v1084_v60 = vld [vmem:[#allocation2 + $0x10] sm:$0xf] }
 0x108   : > { %v791_v29 = vsel %vm1843_vm4, %v786_v2, %v790_v44  ;;  %709 = vst [vmem:[#allocation2 + $0x14] sm:$0x1] %v708_v30  ;;  %v793_v16 = vshrl.u32 %v746_v0, 16  ;;  %v627_v46 = vsel %vm626_vm9, %v1505_v37, %v623_v13  ;;  %v796_v22 = vshll.u32 %v746_v0, 16  ;;  %v752_v2 = vld [vmem:[%s2017_s3] sm:$0xf] }
 0x109   : > { %v879_v20 = vunpack.c.l.b16 %v791_v29  ;;  %712 = vst [vmem:[#allocation2 + $0x1c] sm:$0x1] %v711_v11  ;;  %v807_v25 = vshrl.u32 %v747_v5, 16  ;;  %v681_v10 = vadd.f32 1.0, %v1406_v18  ;;  %v632_v21 = vsel %vm1836_vm3, %v631_v57, %v627_v46  ;;  %v716_v11 = vld [vmem:[#allocation2 + $0x2c] sm:$0x1] }
 0x10a   : > { %1506 = vrcp.f32 %v1866_v4  ;;  %vm890_vm10 = vcmask 64512   ;;  %v346_v24 = vmul.f32 0.5, %v1692_v55  ;;  %v633_v31 = vmul.f32 %v632_v21, %v1827_v19  ;;  %v748_v21 = vld [vmem:[#allocation2 + $0x20] sm:$0xf] }
 0x10b   : > { %v886_v52 = vpack.c.b16 %v879_v20, %v878_v32  ;;  %v689_v27 = vmul.f32 %v681_v10, %v1814_v1  ;;  %v647_v33 = vadd.f32 1.1283791, %v646_v49  ;;  %v795_v35 = vrot.slane %v793_v16, 4  ;;  %v713_v32 = vld [vmem:[#allocation2 + $0x24] sm:$0x1] }
 0x10c   : > { %v798_v7 = vrot.slane %v796_v22, 5  ;;  %v1407_v36 = vclamps-f32 %v633_v31, 1.0  ;;  %v668_v3 = vand.u32 2147483647, %v1866_v4  ;;  %v809_v37 = vrot.slane %v807_v25, 4 }
 0x10d   : > { %1410 = vmatmul.msk.bf16.vlgmr.msra.gmra.mxu1 %vm890_vm10, %v886_v52  ;;  %v810_v34 = vshll.u32 %v747_v5, 16  ;;  %v733_v38 = vpack.c.bf16 %v689_v27, %v689_v27  ;;  %v1099_v55 = vshrl.u32 %v1082_v26, 16  ;;  %v1102_v41 = vshll.u32 %v1082_v26, 16 }
 0x10e   : > { %v799_v39 = vor.u32 %v798_v7, %v795_v35  ;;  %v682_v19 = vadd.f32 1.0, %v1407_v36  ;;  %v1879_v43 = vmul.f32 0.5, %v1743_v15  ;;  %v670_v1 = vand.u32 2147483648, %v1866_v4 }
 0x10f   : > { %v755_v47 = vld [vmem:[#allocation2 + $0x14] sm:$0x1]  ;;  %v812_v48 = vrot.slane %v810_v34, 5  ;;  %741 = vst.msk [vmem:[#allocation2 + $0x28] sm:$0xf] %vm693_vm6, %v733_v38  ;;  %v648_v54 = vmul.f32 %v647_v33, %v1763_v62  ;;  %vm664_vm11 = vweird.f32 %v1866_v4  ;;  %vm1886_vm13 = vcmp.eq.f32.partialorder %v668_v3, 8.507059e+37 }
 0x110   : > { %v1507_v51 = vpop.eup %1506  ;;  %v756_v50 = vld [vmem:[#allocation2 + $0x1c] sm:$0x1]  ;;  %v800_v58 = vrot.slane %v799_v39, 4  ;;  %v802_v8 = vshll.u32 %v755_v47, 16  ;;  %v690_v12 = vmul.f32 %v682_v19, %v346_v24  ;;  %v1101_v61 = vrot.slane %v1099_v55, 4 }
 0x111   : > { %v660_v57 = vmul.f32 %v1507_v51, %v1866_v4  ;;  %vm665_vm12 = vweird.f32 %v1507_v51  ;;  %v813_v59 = vor.u32 %v812_v48, %v809_v37  ;;  %v816_v14 = vshll.u32 %v756_v50, 16  ;;  %v1085_v42 = vld [vmem:[#allocation2 + $0x14] sm:$0x1]  ;;  %v1086_v33 = vld [vmem:[#allocation2 + $0x18] sm:$0xf] }
 0x112   : > { %v804_v23 = vrot.slane %v802_v8, 5  ;;  %v1104_v44 = vrot.slane %v1102_v41, 5  ;;  %v734_v62 = vpack.c.bf16 %v690_v12, %v690_v12  ;;  %v1108_v49 = vshll.u32 %v1083_v40, 16  ;;  %vm666_vm14 = vmor %vm664_vm11, %vm665_vm12  ;;  %v1088_v48 = vld [vmem:[#allocation2 + $0x20] sm:$0xf] }
 0x113   : > { %v661_v45 = vsub.f32 1.0, %v660_v57  ;;  %v814_v28 = vrot.slane %v813_v59, 4  ;;  %v818_v0 = vrot.slane %v816_v14, 5  ;;  %v1113_v56 = vshrl.u32 %v1084_v60, 16  ;;  %v1087_v12 = vld [vmem:[#allocation2 + $0x1c] sm:$0x1] }
 0x114   : > { %v805_v63 = vsel %vm1843_vm4, %v800_v58, %v804_v23  ;;  %v1105_v53 = vor.u32 %v1104_v44, %v1101_v61  ;;  %742 = vst.msk [vmem:[#allocation2 + $0x30] sm:$0xf] %vm693_vm6, %v734_v62  ;;  %v1110_v17 = vrot.slane %v1108_v49, 5  ;;  %v1116_v30 = vshll.u32 %v1084_v60, 16  ;;  %v719_v23 = vld [vmem:[#allocation2 + $0x34] sm:$0x1] }
 0x115   : > { %v662_v5 = vmul.f32 %v1507_v51, %v661_v45  ;;  %v880_v13 = vunpack.c.l.b16 %v805_v63  ;;  %v819_v18 = vsel %vm1843_vm4, %v814_v28, %v818_v0  ;;  %v1115_v16 = vrot.slane %v1113_v56, 4  ;;  %v722_v45 = vld [vmem:[#allocation2 + $0x3c] sm:$0x1] }
 0x116   : > { %v1106_v29 = vrot.slane %v1105_v53, 4  ;;  %v1122_v46 = vshll.u32 %v1085_v42, 16  ;;  %v881_v22 = vunpack.c.l.b16 %v819_v18  ;;  %v1118_v25 = vrot.slane %v1116_v30, 5  ;;  %v749_v24 = vld [vmem:[#allocation2 + $0x28] sm:$0xf] }
 0x117   : > { %v663_v20 = vadd.f32 %v1507_v51, %v662_v5  ;;  %v968_v10 = vsel %vm307_vm0, %v752_v2, 0  ;;  %v671_v31 = vor.u32 1.1754944e-38, %v670_v1  ;;  %v714_v26 = vsel %vm1772_vm7, 0, %v713_v32 }
 0x118   : > { %v1111_v52 = vsel %vm1843_vm4, %v1106_v29, %v1110_v17  ;;  %977 = vmatpush.bf16.msrb.mxu2 %v968_v10  ;;  %v717_v27 = vsel %vm1772_vm7, 0, %v716_v11  ;;  %v887_v7 = vpack.c.b16 %v881_v22, %v880_v13  ;;  %v1119_v36 = vor.u32 %v1118_v25, %v1115_v16  ;;  %715 = vst [vmem:[#allocation2 + $0x24] sm:$0x1] %v714_v26  ;;  %v1434_v13 = vld [vmem:[%s2017_s3 + $0x8] sm:$0xf] }
 0x119   : > { %v667_v35 = vsel %vm666_vm14, %v1507_v51, %v663_v20  ;;  %v1124_v3 = vrot.slane %v1122_v46, 5  ;;  %718 = vst [vmem:[#allocation2 + $0x2c] sm:$0x1] %v717_v27  ;;  %v821_v37 = vshrl.u32 %v748_v21, 16  ;;  %v824_v34 = vshll.u32 %v748_v21, 16 }
 0x11a   : > { %v672_v4 = vsel %vm1886_vm13, %v671_v31, %v667_v35  ;;  %v835_v38 = vshrl.u32 %v749_v24, 16  ;;  %1411 = vmatmul.msk.bf16.vlgmr.msra.gmra.mxu2 %vm890_vm10, %v887_v7  ;;  %v1120_v40 = vrot.slane %v1119_v36, 4  ;;  %v838_v55 = vshll.u32 %v749_v24, 16 }
 0x11b   : > { %v673_v39 = vmul.f32 %v672_v4, %v648_v54  ;;  %v1127_v41 = vshrl.u32 %v1086_v33, 16  ;;  %v823_v19 = vrot.slane %v821_v37, 4  ;;  %v826_v1 = vrot.slane %v824_v34, 5  ;;  %v750_v29 = vld [vmem:[#allocation2 + $0x30] sm:$0xf] }
 0x11c   : > { %v837_v47 = vrot.slane %v835_v38, 4  ;;  %v1130_v51 = vshll.u32 %v1086_v33, 16  ;;  %v1125_v58 = vsel %vm1843_vm4, %v1120_v40, %v1124_v3  ;;  %v840_v8 = vrot.slane %v838_v55, 5  ;;  %v1092_v22 = vld [vmem:[#allocation2 + $0x30] sm:$0xf] }
 0x11d   : > { %v1408_v50 = vclamps-f32 %v673_v39, 1.0  ;;  %v1129_v57 = vrot.slane %v1127_v41, 4  ;;  %v1212_v15 = vunpack.c.l.b16 %v1111_v52  ;;  %v1213_v59 = vunpack.c.l.b16 %v1125_v58  ;;  %v1090_v34 = vld [vmem:[#allocation2 + $0x28] sm:$0xf]  ;;  %v1478_v6 = vld [vmem:[#allocation2 + $0x2c] sm:$0xf0] }
 0x11e   : > { %v827_v54 = vor.u32 %v826_v1, %v823_v19  ;;  %v1132_v60 = vrot.slane %v1130_v51, 5  ;;  %v841_v61 = vor.u32 %v840_v8, %v837_v47  ;;  %v1141_v44 = vshrl.u32 %v1088_v48, 16  ;;  %v698_v51 = vld [vmem:[#allocation2 + $0x44] sm:$0x1] }
 0x11f   : > { %v683_v14 = vadd.f32 1.0, %v1408_v50  ;;  %v1144_v62 = vshll.u32 %v1088_v48, 16  ;;  %v1220_v28 = vpack.c.b16 %v1213_v59, %v1212_v15  ;;  %v757_v42 = vld [vmem:[#allocation2 + $0x24] sm:$0x1]  ;;  %v1136_v0 = vshll.u32 %v1087_v12, 16 }
 0x120   : > { %v1089_v49 = vld [vmem:[#allocation2 + $0x24] sm:$0x1]  ;;  %v1133_v63 = vor.u32 %v1132_v60, %v1129_v57  ;;  %v758_v56 = vld [vmem:[#allocation2 + $0x2c] sm:$0x1]  ;;  %v828_v2 = vrot.slane %v827_v54, 4  ;;  %v830_v32 = vshll.u32 %v757_v42, 16 }
 0x121   : > { %v691_v53 = vmul.f32 %v683_v14, %v1879_v43  ;;  %v1143_v5 = vrot.slane %v1141_v44, 4  ;;  %1456 = vmatmul.msk.bf16.vlgmr.msrb.gmra.mxu1 %vm890_vm10, %v1220_v28  ;;  %v842_v17 = vrot.slane %v841_v61, 4  ;;  %v844_v30 = vshll.u32 %v758_v56, 16 }
 0x122   : > { %v1146_v11 = vrot.slane %v1144_v62, 5  ;;  %v1150_v18 = vshll.u32 %v1089_v49, 16  ;;  %v832_v46 = vrot.slane %v830_v32, 5  ;;  %v720_v43 = vsel %vm1772_vm7, 0, %v719_v23 }
 0x123   : > { %v735_v16 = vpack.c.bf16 %v691_v53, %v691_v53  ;;  %v723_v20 = vsel %vm1772_vm7, 0, %v722_v45  ;;  %v846_v25 = vrot.slane %v844_v30, 5  ;;  %v1134_v10 = vrot.slane %v1133_v63, 4  ;;  %721 = vst [vmem:[#allocation2 + $0x34] sm:$0x1] %v720_v43 }
 0x124   : > { %v1138_v21 = vrot.slane %v1136_v0, 5  ;;  %v1147_v24 = vor.u32 %v1146_v11, %v1143_v5  ;;  %v833_v31 = vsel %vm1843_vm4, %v828_v2, %v832_v46  ;;  %v1152_v52 = vrot.slane %v1150_v18, 5  ;;  %724 = vst [vmem:[#allocation2 + $0x3c] sm:$0x1] %v723_v20  ;;  %v1091_v53 = vld [vmem:[#allocation2 + $0x2c] sm:$0x1] }
 0x125   : > { %743 = vst.msk [vmem:[#allocation2 + $0x38] sm:$0xf] %vm693_vm6, %v735_v16  ;;  %v849_v26 = vshrl.u32 %v750_v29, 16  ;;  %v852_v27 = vshll.u32 %v750_v29, 16  ;;  %v847_v33 = vsel %vm1843_vm4, %v842_v17, %v846_v25  ;;  %v1043_v7 = vsel %vm307_vm0, %v1434_v13, 0 }
 0x126   : > { %v1148_v35 = vrot.slane %v1147_v24, 4  ;;  %v882_v36 = vunpack.c.l.b16 %v833_v31  ;;  %v883_v3 = vunpack.c.l.b16 %v847_v33  ;;  %1052 = vmatpush.bf16.msrb.mxu3 %v1043_v7  ;;  %v1169_v38 = vshrl.u32 %v1092_v22, 16  ;;  %v1472_v29 = vld [vmem:[#allocation2 + $0x4] sm:$0xf0] }
 0x127   : > { %v851_v4 = vrot.slane %v849_v26, 4  ;;  %v854_v37 = vrot.slane %v852_v27, 5  ;;  %v1139_v40 = vsel %vm1843_vm4, %v1134_v10, %v1138_v21  ;;  %v1155_v19 = vshrl.u32 %v1090_v34, 16  ;;  %v1416_v10 = vld [vmem:[#allocation2] sm:$0xf] }
 0x128   : > { %v888_v39 = vpack.c.b16 %v883_v3, %v882_v36  ;;  %v1153_v55 = vsel %vm1843_vm4, %v1148_v35, %v1152_v52  ;;  %v1158_v1 = vshll.u32 %v1090_v34, 16  ;;  %v1172_v47 = vshll.u32 %v1092_v22, 16 }
 0x129   : > { %v855_v41 = vor.u32 %v854_v37, %v851_v4  ;;  %v1215_v50 = vunpack.c.l.b16 %v1153_v55  ;;  %v1171_v12 = vrot.slane %v1169_v38, 4  ;;  %v1214_v15 = vunpack.c.l.b16 %v1139_v40 }
 0x12a   : > { %1412 = vmatmul.msk.bf16.gmra.mxu2 %vm890_vm10, %v888_v39  ;;  %v759_v48 = vld [vmem:[#allocation2 + $0x34] sm:$0x1]  ;;  %v1174_v57 = vrot.slane %v1172_v47, 5  ;;  %v1516_v23 = vmov 0   ;;  %v1157_v62 = vrot.slane %v1155_v19, 4  ;;  %v1160_v45 = vrot.slane %v1158_v1, 5 }
 0x12b   : > { %v858_v8 = vshll.u32 %v759_v48, 16  ;;  %v760_v59 = vld [vmem:[#allocation2 + $0x3c] sm:$0x1]  ;;  %694 = vst.msk [vmem:[#allocation2 + $0x40] sm:$0xf] %vm693_vm6, %v1516_v23  ;;  %v856_v14 = vrot.slane %v855_v41, 4  ;;  %v1221_v0 = vpack.c.b16 %v1215_v50, %v1214_v15  ;;  %v1417_v26 = vor.u32 %v1472_v29, %v1416_v10 }
 0x12c   : > { %v751_v58 = vld [vmem:[#allocation2 + $0x38] sm:$0xf]  ;;  %v872_v61 = vshll.u32 %v760_v59, 16  ;;  %v1093_v44 = vld [vmem:[#allocation2 + $0x34] sm:$0x1]  ;;  %v699_v63 = vsel %vm1772_vm7, 0, %v698_v51  ;;  %v1175_v32 = vor.u32 %v1174_v57, %v1171_v12  ;;  %v1161_v30 = vor.u32 %v1160_v45, %v1157_v62 }
 0x12d   : > { %v863_v54 = vshrl.u32 %v751_v58, 16  ;;  %v866_v60 = vshll.u32 %v751_v58, 16  ;;  %v860_v28 = vrot.slane %v858_v8, 5  ;;  %700 = vst [vmem:[#allocation2 + $0x44] sm:$0x1] %v699_v63  ;;  %v1178_v5 = vshll.u32 %v1093_v44, 16 }
 0x12e   : > { %v874_v2 = vrot.slane %v872_v61, 5  ;;  %v1164_v11 = vshll.u32 %v1091_v53, 16  ;;  %v1176_v16 = vrot.slane %v1175_v32, 4  ;;  %v1094_v43 = vld [vmem:[#allocation2 + $0x38] sm:$0xf]  ;;  %v1162_v21 = vrot.slane %v1161_v30, 4 }
 0x12f   : > { %v865_v42 = vrot.slane %v863_v54, 4  ;;  %v868_v49 = vrot.slane %v866_v60, 5  ;;  %v861_v13 = vsel %vm1843_vm4, %v856_v14, %v860_v28  ;;  %v1180_v46 = vrot.slane %v1178_v5, 5  ;;  %v1095_v55 = vld [vmem:[#allocation2 + $0x3c] sm:$0x1] }
 0x130   : > { %v884_v20 = vunpack.c.l.b16 %v861_v13  ;;  %v1166_v24 = vrot.slane %v1164_v11, 5  ;;  %v1183_v33 = vshrl.u32 %v1094_v43, 16  ;;  %v1186_v7 = vshll.u32 %v1094_v43, 16  ;;  %v1476_v50 = vld [vmem:[#allocation2 + $0xc] sm:$0xf0] }
 0x131   : > { %v869_v56 = vor.u32 %v868_v49, %v865_v42  ;;  %1457 = vmatmul.msk.bf16.gmra.mxu1 %vm890_vm10, %v1221_v0  ;;  %v1181_v35 = vsel %vm1843_vm4, %v1176_v16, %v1180_v46  ;;  %v1192_v47 = vshll.u32 %v1095_v55, 16  ;;  %v1473_v15 = vld [vmem:[#allocation2 + $0x14] sm:$0xf0]  ;;  %v1437_v59 = vld [vmem:[#allocation2 + $0x8] sm:$0xf]  ;;  %vm1292_vm0 = vcmask 130048  }
 0x132   : > { %v1096_v25 = vld [vmem:[#allocation2 + $0x40] sm:$0xf]  ;;  %v1167_v4 = vsel %vm1843_vm4, %v1162_v21, %v1166_v24  ;;  %v1217_v37 = vunpack.c.l.b16 %v1181_v35  ;;  %v1185_v34 = vrot.slane %v1183_v33, 4  ;;  %v1188_v38 = vrot.slane %v1186_v7, 5  ;;  %v1420_v54 = vld [vmem:[#allocation2 + $0x10] sm:$0xf] }
 0x133   : > { %v870_v17 = vrot.slane %v869_v56, 4  ;;  %v1197_v36 = vshrl.u32 %v1096_v25, 16  ;;  %v1200_v3 = vshll.u32 %v1096_v25, 16  ;;  %v1216_v40 = vunpack.c.l.b16 %v1167_v4  ;;  %v1477_v28 = vld [vmem:[#allocation2 + $0x1c] sm:$0xf0] }
 0x134   : > { %v725_v31 = vld [vmem:[#allocation2 + $0x44] sm:$0x1]  ;;  %v1189_v1 = vor.u32 %v1188_v38, %v1185_v34  ;;  %v1194_v8 = vrot.slane %v1192_v47, 5  ;;  %v1438_v60 = vor.u32 %v1476_v50, %v1437_v59  ;;  %v1421_v23 = vor.u32 %v1473_v15, %v1420_v54  ;;  %v1474_v42 = vld [vmem:[#allocation2 + $0x24] sm:$0xf0]  ;;  %v1278_v47 = vld [vmem:[%s2018_s4 + $0x10] sm:$0xff] }
 0x135   : > { %v875_v18 = vsel %vm1843_vm4, %v870_v17, %v874_v2  ;;  %v726_v27 = vsel %vm1772_vm7, 0, %v725_v31  ;;  %v1199_v9 = vrot.slane %v1197_v36, 4  ;;  %v1202_v39 = vrot.slane %v1200_v3, 5  ;;  %v1441_v49 = vld [vmem:[#allocation2 + $0x18] sm:$0xf]  ;;  %v1276_v35 = vld [vmem:[%s2018_s4] sm:$0xff] }
 0x136   : > { %v885_v22 = vunpack.c.l.b16 %v875_v18  ;;  %727 = vst [vmem:[#allocation2 + $0x44] sm:$0x1] %v726_v27  ;;  %v1222_v41 = vpack.c.b16 %v1217_v37, %v1216_v40  ;;  %v1190_v58 = vrot.slane %v1189_v1, 4  ;;  %v1424_v63 = vld [vmem:[#allocation2 + $0x20] sm:$0xf]  ;;  %v1442_v0 = vor.u32 %v1477_v28, %v1441_v49  ;;  %v1277_v38 = vld [vmem:[%s2018_s4 + $0x8] sm:$0xff] }
 0x137   : > { %v1203_v48 = vor.u32 %v1202_v39, %v1199_v9  ;;  %v1425_v53 = vor.u32 %v1474_v42, %v1424_v63  ;;  %v1475_v56 = vld [vmem:[#allocation2 + $0x34] sm:$0xf0]  ;;  %v1445_v2 = vld [vmem:[#allocation2 + $0x28] sm:$0xf]  ;;  %v1428_v32 = vld [vmem:[#allocation2 + $0x30] sm:$0xf] }
 0x138   : > { %v889_v52 = vpack.c.b16 %v885_v22, %v884_v20  ;;  %v1195_v14 = vsel %vm1843_vm4, %v1190_v58, %v1194_v8  ;;  %v1446_v5 = vor.u32 %v1478_v6, %v1445_v2  ;;  %v1429_v13 = vor.u32 %v1475_v56, %v1428_v32  ;;  %v1449_v17 = vld [vmem:[#allocation2 + $0x38] sm:$0xf]  ;;  %v1479_v30 = vld [vmem:[#allocation2 + $0x3c] sm:$0xf0] }
 0x139   : > { %v1204_v12 = vrot.slane %v1203_v48, 4  ;;  %v1218_v44 = vunpack.c.l.b16 %v1195_v14  ;;  %v1450_v11 = vor.u32 %v1479_v30, %v1449_v17  ;;  %v1282_v17 = vld [vmem:[%s2018_s4 + $0x30] sm:$0xff] }
 0x13a   : > { %1413 = vmatmul.msk.bf16.vlgmr.msra.gmra.mxu3 %vm890_vm10, %v889_v52  ;;  %1430 = vmatmul.msk.bf16.vlgmr.msrb.gmra.mxu2 %vm890_vm10, %v1417_v26 }
 0x13d   : > { %v1097_v19 = vld [vmem:[#allocation2 + $0x44] sm:$0x1] }
 0x13e   : > { %v1206_v51 = vshll.u32 %v1097_v19, 16 }
 0x140   : > { %v1208_v57 = vrot.slane %v1206_v51, 5 }
 0x141   : > { %1458 = vmatmul.msk.bf16.gmra.mxu1 %vm890_vm10, %v1222_v41 }
 0x142   : > { %v1209_v61 = vsel %vm1843_vm4, %v1204_v12, %v1208_v57  ;;  %v1279_v57 = vld [vmem:[%s2018_s4 + $0x18] sm:$0xff] }
 0x143   : > { %v1219_v62 = vunpack.c.l.b16 %v1209_v61 }
 0x145   : > { %v1223_v45 = vpack.c.b16 %v1219_v62, %v1218_v44  ;;  %v1280_v44 = vld [vmem:[%s2018_s4 + $0x20] sm:$0xff] }
 0x14a   : > { %1451 = vmatmul.msk.bf16.vlgmr.msrb.gmra.mxu3 %vm890_vm10, %v1438_v60  ;;  %1431 = vmatmul.msk.bf16.gmra.mxu2 %vm890_vm10, %v1421_v23 }
 0x151   : > { %1459 = vmatmul.msk.bf16.gmra.mxu1 %vm890_vm10, %v1223_v45 }
 0x15a   : > { %1452 = vmatmul.msk.bf16.gmra.mxu3 %vm890_vm10, %v1442_v0  ;;  %1432 = vmatmul.msk.bf16.gmra.mxu2 %vm890_vm10, %v1425_v53  ;;  %v1281_v53 = vld [vmem:[%s2018_s4 + $0x28] sm:$0xff] }
 0x16a   : > { %1453 = vmatmul.msk.bf16.gmra.mxu3 %vm890_vm10, %v1446_v5  ;;  %1433 = vmatmul.msk.bf16.gmra.mxu2 %vm890_vm10, %v1429_v13 }
 0x17a   : > { %1454 = vmatmul.msk.bf16.gmra.mxu3 %vm890_vm10, %v1450_v11 }
 0x18a   : > { %v915_v16 = vpop.f32.mrf.mxu1 }
 0x192   : > { %v917_v20 = vpop.f32.mrf.mxu1 }
 0x19d   : > { %v920_v18 = vpop.f32.mrf.mxu2 }
 0x19e   : > { %v1248_v10 = vpop.f32.mrf.mxu1 }
 0x1a5   : > { %v922_v29 = vpop.f32.mrf.mxu2 }
 0x1a6   : > { %v1250_v31 = vpop.f32.mrf.mxu1 }
 0x1ad   : > { %v925_v46 = vpop.f32.mrf.mxu2 }
 0x1ae   : > { %v1253_v4 = vpop.f32.mrf.mxu1 }
 0x1b5   : > { %v927_v43 = vpop.f32.mrf.mxu2 }
 0x1b6   : > { %v1255_v1 = vpop.f32.mrf.mxu1 }
 0x1bd   : > { %v930_v22 = vpop.f32.mrf.mxu3  ;;  %v979_v25 = vpop.f32.mrf.mxu2 }
 0x1be   : > { %v980_v52 = vadd.f32 %v979_v25, %v915_v16  ;;  %v1258_v59 = vpop.f32.mrf.mxu1 }
 0x1c5   : > { %v1962_v21 = vpop.f32.mrf.mxu3  ;;  %v981_v24 = vpop.f32.mrf.mxu2 }
 0x1c6   : > { %v982_v3 = vadd.f32 %v981_v24, %v917_v20  ;;  %v1260_v28 = vpop.f32.mrf.mxu1  ;;  %v1283_v20 = vld [vmem:[%s2018_s4 + $0x38] sm:$0xff] }
 0x1cd   : > { %v1054_v26 = vpop.f32.mrf.mxu3  ;;  %v984_v33 = vpop.f32.mrf.mxu2 }
 0x1ce   : > { %v1074_v27 = vadd.f32 %v1054_v26, %v980_v52  ;;  %v985_v55 = vadd.f32 %v984_v33, %v920_v18  ;;  %v1263_v32 = vpop.f32.mrf.mxu1 }
 0x1d0   : > { %v1268_v7 = vadd.f32 %v1248_v10, %v1074_v27 }
 0x1d2   : > { %v1284_v36 = vadd.f32 %v1276_v35, %v1268_v7 }
 0x1d4   : > { %1293 = vst.msk [vmem:[%s1971_s26] sm:$0xff] %vm1292_vm0, %v1284_v36 }
 0x1d5   : > { %v1056_v37 = vpop.f32.mrf.mxu3  ;;  %v986_v39 = vpop.f32.mrf.mxu2 }
 0x1d6   : > { %v1075_v34 = vadd.f32 %v1056_v37, %v982_v3  ;;  %v987_v58 = vadd.f32 %v986_v39, %v922_v29 }
 0x1d8   : > { %v1269_v9 = vadd.f32 %v1250_v31, %v1075_v34 }
 0x1da   : > { %v1285_v40 = vadd.f32 %v1277_v38, %v1269_v9 }
 0x1dc   : > { %1294 = vst.msk [vmem:[%s1971_s26 + $0x8] sm:$0xff] %vm1292_vm0, %v1285_v40 }
 0x1dd   : > { %v1059_v41 = vpop.f32.mrf.mxu3  ;;  %v989_v50 = vpop.f32.mrf.mxu2 }
 0x1de   : > { %v1076_v19 = vadd.f32 %v1059_v41, %v985_v55  ;;  %v990_v60 = vadd.f32 %v989_v50, %v925_v46 }
 0x1e0   : > { %v1270_v48 = vadd.f32 %v1253_v4, %v1076_v19 }
 0x1e2   : > { %v1286_v51 = vadd.f32 %v1278_v47, %v1270_v48 }
 0x1e4   : > { %1295 = vst.msk [vmem:[%s1971_s26 + $0x10] sm:$0xff] %vm1292_vm0, %v1286_v51 }
 0x1e5   : > { %v1061_v8 = vpop.f32.mrf.mxu3  ;;  %v991_v23 = vpop.f32.mrf.mxu2 }
 0x1e6   : > { %v1077_v12 = vadd.f32 %v1061_v8, %v987_v58  ;;  %v992_v42 = vadd.f32 %v991_v23, %v927_v43  ;;  %v1265_v43 = vpop.f32.mrf.mxu1 }
 0x1e8   : > { %v1271_v15 = vadd.f32 %v1255_v1, %v1077_v12 }
 0x1ea   : > { %v1287_v54 = vadd.f32 %v1279_v57, %v1271_v15 }
 0x1ec   : > { %1296 = vst.msk [vmem:[%s1971_s26 + $0x18] sm:$0xff] %vm1292_vm0, %v1287_v54 }
 0x1ed   : > { %v1064_v14 = vpop.f32.mrf.mxu3  ;;  %v994_v0 = vpop.f32.mrf.mxu2 }
 0x1ee   : > { %v1078_v61 = vadd.f32 %v1064_v14, %v990_v60  ;;  %v995_v2 = vadd.f32 %v994_v0, %v930_v22 }
 0x1f0   : > { %v1272_v62 = vadd.f32 %v1258_v59, %v1078_v61 }
 0x1f2   : > { %v1288_v45 = vadd.f32 %v1280_v44, %v1272_v62 }
 0x1f4   : > { %1297 = vst.msk [vmem:[%s1971_s26 + $0x20] sm:$0xff] %vm1292_vm0, %v1288_v45 }
 0x1f5   : > { %v1066_v49 = vpop.f32.mrf.mxu3  ;;  %v996_v11 = vpop.f32.mrf.mxu2 }
 0x1f6   : > { %v1079_v63 = vadd.f32 %v1066_v49, %v992_v42  ;;  %v997_v29 = vadd.f32 %v996_v11, %v1962_v21 }
 0x1f8   : > { %v1273_v6 = vadd.f32 %v1260_v28, %v1079_v63 }
 0x1fa   : > { %v1289_v56 = vadd.f32 %v1281_v53, %v1273_v6 }
 0x1fc   : > { %1298 = vst.msk [vmem:[%s1971_s26 + $0x28] sm:$0xff] %vm1292_vm0, %v1289_v56 }
 0x1fd   : > { %v1069_v5 = vpop.f32.mrf.mxu3 }
 0x1fe   : > { %v1080_v13 = vadd.f32 %v1069_v5, %v995_v2 }
 0x200   : > { %v1274_v30 = vadd.f32 %v1263_v32, %v1080_v13 }
 0x202   : > { %v1290_v18 = vadd.f32 %v1282_v17, %v1274_v30 }
 0x204   : > { %1299 = vst.msk [vmem:[%s1971_s26 + $0x30] sm:$0xff] %vm1292_vm0, %v1290_v18 }
 0x205   : > { %v1071_v16 = vpop.f32.mrf.mxu3 }
 0x206   : > { %v1081_v46 = vadd.f32 %v1071_v16, %v997_v29 }
 0x208   : > { %v1275_v22 = vadd.f32 %v1265_v43, %v1081_v46 }
 0x20a   : > { %v1291_v25 = vadd.f32 %v1283_v20, %v1275_v22 }
 0x20c   : > { %1300 = vst.msk [vmem:[%s1971_s26 + $0x38] sm:$0xff] %vm1292_vm0, %v1291_v25 }
 0x20d PF: > { %s15_s18 = sadd.s32 1, %s1514_s18  }
 0x20e   : > { %p12_p4 = scmp.ge.s32.totalorder %s15_s18, 4  }
 0x210   :  { %14 = sbr.rel (!%p12_p4) target bundleno = 1 (0x1), region = 75 }

</bundles_post_ra>
